<compile_context>
chip_gen: v5e
topology: v5e:2x2
jax: 0.10.0
libtpu: 0.0.40
codegen_flags: <defaults>
</compile_context>

<pallas_src>
import math

import jax
import jax.numpy as jnp
from jax import lax
from jax.experimental import pallas as pl
from jax.experimental.pallas import tpu as pltpu

NUM_RES_BLOCKS = 4  # model_DL default


def _gelu_exact(t):
    # PyTorch nn.GELU() default: exact erf formulation (computed in f32).
    return 0.5 * t * (1.0 + lax.erf(t * (1.0 / math.sqrt(2.0))))


def _round_up(x, m):
    return ((x + m - 1) // m) * m


def model_dl_kernel(xT_ref, win_ref, bin_ref,
                    w1_ref, b1_ref, w2_ref, b2_ref,
                    wout_ref, bout_ref, o_ref, h_ref):
    """Grid = (batch_tiles,).  Everything is computed in (H, TB) layout."""
    # ---- input projection: (H, n) @ (n, TB) -> (H, TB), f32 accumulate ----
    h_ref[...] = (
        jnp.dot(win_ref[...], xT_ref[...].astype(jnp.bfloat16),
                preferred_element_type=jnp.float32)
        + bin_ref[...])

    # ---- R residual blocks, weights fully resident in VMEM ----
    R = w1_ref.shape[0]
    for r in range(R):
        h = h_ref[...]                                       # (H, TB) f32
        t = (jnp.dot(w1_ref[r], h.astype(jnp.bfloat16),
                     preferred_element_type=jnp.float32)
             + b1_ref[r])
        t = _gelu_exact(t)
        t = (jnp.dot(w2_ref[r], t.astype(jnp.bfloat16),
                     preferred_element_type=jnp.float32)
             + b2_ref[r])
        # Round-trip through VMEM scratch bounds vreg live ranges per block.
        h_ref[...] = h + t

    # ---- output head (N=1): VPU multiply + sublane reduce -> dense (1, TB) ----
    h = h_ref[...]
    y = jnp.sum(h * wout_ref[...], axis=0, keepdims=True) + bout_ref[...]
    o_ref[...] = y.astype(o_ref.dtype)


def _vmem_budget_bytes(n, H, R, TB):
    bf16, f32, lane = 2, 4, 128
    pad = lambda d: _round_up(d, lane)
    weights = (H * pad(n) * bf16                    # w_in
               + H * lane * f32                     # b_in (H,1) lane-padded
               + 2 * R * H * pad(H) * bf16          # w1, w2 (resident)
               + 2 * R * H * lane * f32             # b1, b2
               + H * lane * f32 + 8 * lane * f32)   # w_out, b_out
    io = 2 * (n * TB * f32) + 2 * (8 * TB * f32)    # double-buffered xT / o tiles
    scratch = H * TB * f32                          # h accumulator
    need = weights + io + scratch
    return int(min(max(2 * need, 4 << 20), 32 << 20))


def model_dl_forward(x, params, *, tb=1024):
    """x: (B, n) float32. params: PyTorch-oriented (out, in) weights, bf16 matmul."""
    B, n = x.shape
    H = params["w_in"].shape[0]
    R = params["w1"].shape[0]

    # Batch tile: multiple of 128 (lane axis), capped at `tb`, and clamped so a
    # large batch splits into >= 2 tiles (keeps both v7x TensorCores busy).
    TB = _round_up(max(1, min(tb, -(-B // 2))), 128)
    B_pad = _round_up(B, TB)
    if B_pad != B:
        x = jnp.pad(x, ((0, B_pad - B), (0, 0)))
    num_tiles = B_pad // TB
    xT = x.T  # (n, B_pad) — transpose once in the wrapper

    out = pl.pallas_call(
        model_dl_kernel,
        out_shape=jax.ShapeDtypeStruct((num_tiles, TB), jnp.float32),
        grid=(num_tiles,),
        in_specs=[
            pl.BlockSpec((n, TB), lambda i: (0, i)),           # x^T tile
            pl.BlockSpec((H, n), lambda i: (0, 0)),            # w_in (resident)
            pl.BlockSpec((H, 1), lambda i: (0, 0)),            # b_in
            pl.BlockSpec((R, H, H), lambda i: (0, 0, 0)),      # w1 (all R resident)
            pl.BlockSpec((R, H, 1), lambda i: (0, 0, 0)),      # b1
            pl.BlockSpec((R, H, H), lambda i: (0, 0, 0)),      # w2
            pl.BlockSpec((R, H, 1), lambda i: (0, 0, 0)),      # b2
            pl.BlockSpec((H, 1), lambda i: (0, 0)),            # w_out column
            pl.BlockSpec((1, 1), lambda i: (0, 0)),            # b_out
        ],
        out_specs=pl.BlockSpec((1, TB), lambda i: (i, 0)),     # lane-dense row store
        scratch_shapes=[pltpu.VMEM((H, TB), jnp.float32)],
        compiler_params=pltpu.CompilerParams(
            dimension_semantics=("parallel",),
            vmem_limit_bytes=_vmem_budget_bytes(n, H, R, TB),
        ),
    )(xT,
      params["w_in"], params["b_in"],
      params["w1"], params["b1"], params["w2"], params["b2"],
      params["w_out"], params["b_out"])

    return out.reshape(B_pad, 1)[:B]


def init_params(key, n, p=1, num_residual_blocks=NUM_RES_BLOCKS):
    """Deterministic synthetic params (shapes mirror the PyTorch module).

    Linear weights are kept in PyTorch (out, in) orientation and stored bf16
    for the MXU; biases are f32 columns (broadcast along the TB lane axis).
    """
    H = n * p
    R = num_residual_blocks
    ks = jax.random.split(key, 6)
    scale = 0.1
    w_in = (scale * jax.random.normal(ks[0], (H, n), jnp.float32)).astype(jnp.bfloat16)
    b_in = scale * jax.random.normal(ks[1], (H, 1), jnp.float32)
    w1 = (scale * jax.random.normal(ks[2], (R, H, H), jnp.float32)).astype(jnp.bfloat16)
    b1 = scale * jax.random.normal(ks[3], (R, H, 1), jnp.float32)
    w2 = (scale * jax.random.normal(ks[4], (R, H, H), jnp.float32)).astype(jnp.bfloat16)
    b2 = scale * jax.random.normal(ks[5], (R, H, 1), jnp.float32)
    kw, kb = jax.random.split(jax.random.fold_in(key, 123))
    w_out = scale * jax.random.normal(kw, (H, 1), jnp.float32)
    b_out = scale * jax.random.normal(kb, (1, 1), jnp.float32)
    return dict(w_in=w_in, b_in=b_in, w1=w1, b1=b1, w2=w2, b2=b2,
                w_out=w_out, b_out=b_out)


def reference_forward(x, params):
    """Pure-JAX reference mirroring the kernel numerics (bf16 matmul, f32 acc)."""
    def mm(w, a):   # (O, I) bf16 @ (I, B) -> (O, B) f32
        return jnp.dot(w, a.astype(jnp.bfloat16), preferred_element_type=jnp.float32)

    R = params["w1"].shape[0]
    hT = mm(params["w_in"], x.T) + params["b_in"]
    for r in range(R):
        t = mm(params["w1"][r], hT) + params["b1"][r]
        t = _gelu_exact(t)
        t = mm(params["w2"][r], t) + params["b2"][r]
        hT = hT + t
    y = jnp.sum(hT * params["w_out"], axis=0, keepdims=True) + params["b_out"]
    return y.T  # (B, 1)


if __name__ == "__main__":
    n = 32          # in_features
    p = 1           # hidden multiplier (model_DL default)

    key = jax.random.PRNGKey(0)
    kx, kp = jax.random.split(key)
    params = init_params(kp, n, p)

    # Case 1: small batch -> single 128-row tile (padded).
    x1 = jax.random.normal(kx, (8, n), jnp.float32)
    out1 = jax.block_until_ready(model_dl_forward(x1, params))
    ref1 = reference_forward(x1, params)
    assert out1.shape == (8, 1)
    assert jnp.allclose(out1, ref1, atol=2e-3, rtol=2e-3), "mismatch vs reference (case 1)"

    # Case 2: batch not a multiple of the tile -> padding + multi-tile grid.
    x2 = jax.random.normal(jax.random.fold_in(kx, 1), (300, n), jnp.float32)
    out2 = jax.block_until_ready(model_dl_forward(x2, params, tb=128))
    ref2 = reference_forward(x2, params)
    assert out2.shape == (300, 1)
    assert jnp.allclose(out2, ref2, atol=2e-3, rtol=2e-3), "mismatch vs reference (case 2)"

    print("KERNEL_OK")
</pallas_src>

<mosaic_0001>
module attributes {stable_mosaic.version = 11 : i64} {
  func.func @model_dl_kernel(%arg0: i32, %arg1: memref<32x128xf32, #tpu.memory_space<vmem>>, %arg2: memref<32x32xbf16, #tpu.memory_space<vmem>>, %arg3: memref<32x1xf32, #tpu.memory_space<vmem>>, %arg4: memref<4x32x32xbf16, #tpu.memory_space<vmem>>, %arg5: memref<4x32x1xf32, #tpu.memory_space<vmem>>, %arg6: memref<4x32x32xbf16, #tpu.memory_space<vmem>>, %arg7: memref<4x32x1xf32, #tpu.memory_space<vmem>>, %arg8: memref<32x1xf32, #tpu.memory_space<vmem>>, %arg9: memref<1x1xf32, #tpu.memory_space<vmem>>, %arg10: memref<1x128xf32, #tpu.memory_space<vmem>>, %arg11: memref<32x128xf32, #tpu.memory_space<vmem>>) attributes {dimension_semantics = [#tpu.dimension_semantics<parallel>], iteration_bounds = array<i64: 1>, scalar_prefetch = 0 : i64, scratch_operands = 1 : i64, tpu.core_type = #tpu.core_type<tc>, window_params = [{transform_indices = @transform_0, window_bounds = array<i64: 32, 128>}, {pipeline_mode = #tpu.pipeline_mode<synchronous>, transform_indices = @transform_1, window_bounds = array<i64: 32, 32>}, {pipeline_mode = #tpu.pipeline_mode<synchronous>, transform_indices = @transform_2, window_bounds = array<i64: 32, 1>}, {pipeline_mode = #tpu.pipeline_mode<synchronous>, transform_indices = @transform_3, window_bounds = array<i64: 4, 32, 32>}, {pipeline_mode = #tpu.pipeline_mode<synchronous>, transform_indices = @transform_4, window_bounds = array<i64: 4, 32, 1>}, {pipeline_mode = #tpu.pipeline_mode<synchronous>, transform_indices = @transform_5, window_bounds = array<i64: 4, 32, 32>}, {pipeline_mode = #tpu.pipeline_mode<synchronous>, transform_indices = @transform_6, window_bounds = array<i64: 4, 32, 1>}, {pipeline_mode = #tpu.pipeline_mode<synchronous>, transform_indices = @transform_7, window_bounds = array<i64: 32, 1>}, {pipeline_mode = #tpu.pipeline_mode<synchronous>, transform_indices = @transform_8, window_bounds = array<i64: 1, 1>}, {transform_indices = @transform_9, window_bounds = array<i64: 1, 128>}]} {
    %c0 = arith.constant 0 : index
    %c0_0 = arith.constant 0 : index
    %0 = vector.load %arg2[%c0, %c0_0] : memref<32x32xbf16, #tpu.memory_space<vmem>>, vector<32x32xbf16>
    %c0_1 = arith.constant 0 : index
    %c0_2 = arith.constant 0 : index
    %1 = vector.load %arg1[%c0_1, %c0_2] : memref<32x128xf32, #tpu.memory_space<vmem>>, vector<32x128xf32>
    %2 = arith.truncf %1 : vector<32x128xf32> to vector<32x128xbf16>
    %cst = arith.constant dense<0.000000e+00> : vector<32x128xf32>
    %3 = tpu.matmul %0, %2, %cst {dimension_numbers = #tpu.dot_dimension_numbers<[1], [0], [0], [1], [0, 0, 1, 1], [], []>} : vector<32x32xbf16>, vector<32x128xbf16>, vector<32x128xf32> -> vector<32x128xf32>
    %c0_3 = arith.constant 0 : index
    %c0_4 = arith.constant 0 : index
    %4 = vector.load %arg3[%c0_3, %c0_4] : memref<32x1xf32, #tpu.memory_space<vmem>>, vector<32x1xf32>
    %5 = vector.broadcast %4 : vector<32x1xf32> to vector<32x128xf32>
    %6 = arith.addf %3, %5 : vector<32x128xf32>
    %c0_5 = arith.constant 0 : index
    %c0_6 = arith.constant 0 : index
    %7 = vector.load %arg11[%c0_5, %c0_6] : memref<32x128xf32, #tpu.memory_space<vmem>>, vector<32x128xf32>
    tpu.vector_store %arg11[%c0_5, %c0_6], %6 {strides = array<i32>} : memref<32x128xf32, #tpu.memory_space<vmem>>, vector<32x128xf32>,
    %c0_7 = arith.constant 0 : index
    %c0_8 = arith.constant 0 : index
    %8 = vector.load %arg11[%c0_7, %c0_8] : memref<32x128xf32, #tpu.memory_space<vmem>>, vector<32x128xf32>
    %c0_9 = arith.constant 0 : index
    %c0_10 = arith.constant 0 : index
    %c0_11 = arith.constant 0 : index
    %9 = vector.load %arg4[%c0_9, %c0_10, %c0_11] : memref<4x32x32xbf16, #tpu.memory_space<vmem>>, vector<1x32x32xbf16>
    %10 = vector.shape_cast %9 : vector<1x32x32xbf16> to vector<32x32xbf16>
    %11 = arith.truncf %8 : vector<32x128xf32> to vector<32x128xbf16>
    %cst_12 = arith.constant dense<0.000000e+00> : vector<32x128xf32>
    %12 = tpu.matmul %10, %11, %cst_12 {dimension_numbers = #tpu.dot_dimension_numbers<[1], [0], [0], [1], [0, 0, 1, 1], [], []>} : vector<32x32xbf16>, vector<32x128xbf16>, vector<32x128xf32> -> vector<32x128xf32>
    %c0_13 = arith.constant 0 : index
    %c0_14 = arith.constant 0 : index
    %c0_15 = arith.constant 0 : index
    %13 = vector.load %arg5[%c0_13, %c0_14, %c0_15] : memref<4x32x1xf32, #tpu.memory_space<vmem>>, vector<1x32x1xf32>
    %14 = vector.shape_cast %13 : vector<1x32x1xf32> to vector<32x1xf32>
    %15 = vector.broadcast %14 : vector<32x1xf32> to vector<32x128xf32>
    %16 = arith.addf %12, %15 : vector<32x128xf32>
    %cst_16 = arith.constant 5.000000e-01 : f32
    %17 = vector.broadcast %cst_16 : f32 to vector<32x128xf32>
    %18 = arith.mulf %17, %16 : vector<32x128xf32>
    %cst_17 = arith.constant 0.707106769 : f32
    %19 = vector.broadcast %cst_17 : f32 to vector<32x128xf32>
    %20 = arith.mulf %16, %19 : vector<32x128xf32>
    %21 = math.erf %20 : vector<32x128xf32>
    %cst_18 = arith.constant 1.000000e+00 : f32
    %22 = vector.broadcast %cst_18 : f32 to vector<32x128xf32>
    %23 = arith.addf %22, %21 : vector<32x128xf32>
    %24 = arith.mulf %18, %23 : vector<32x128xf32>
    %c0_19 = arith.constant 0 : index
    %c0_20 = arith.constant 0 : index
    %c0_21 = arith.constant 0 : index
    %25 = vector.load %arg6[%c0_19, %c0_20, %c0_21] : memref<4x32x32xbf16, #tpu.memory_space<vmem>>, vector<1x32x32xbf16>
    %26 = vector.shape_cast %25 : vector<1x32x32xbf16> to vector<32x32xbf16>
    %27 = arith.truncf %24 : vector<32x128xf32> to vector<32x128xbf16>
    %cst_22 = arith.constant dense<0.000000e+00> : vector<32x128xf32>
    %28 = tpu.matmul %26, %27, %cst_22 {dimension_numbers = #tpu.dot_dimension_numbers<[1], [0], [0], [1], [0, 0, 1, 1], [], []>} : vector<32x32xbf16>, vector<32x128xbf16>, vector<32x128xf32> -> vector<32x128xf32>
    %c0_23 = arith.constant 0 : index
    %c0_24 = arith.constant 0 : index
    %c0_25 = arith.constant 0 : index
    %29 = vector.load %arg7[%c0_23, %c0_24, %c0_25] : memref<4x32x1xf32, #tpu.memory_space<vmem>>, vector<1x32x1xf32>
    %30 = vector.shape_cast %29 : vector<1x32x1xf32> to vector<32x1xf32>
    %31 = vector.broadcast %30 : vector<32x1xf32> to vector<32x128xf32>
    %32 = arith.addf %28, %31 : vector<32x128xf32>
    %33 = arith.addf %8, %32 : vector<32x128xf32>
    %c0_26 = arith.constant 0 : index
    %c0_27 = arith.constant 0 : index
    %34 = vector.load %arg11[%c0_26, %c0_27] : memref<32x128xf32, #tpu.memory_space<vmem>>, vector<32x128xf32>
    tpu.vector_store %arg11[%c0_26, %c0_27], %33 {strides = array<i32>} : memref<32x128xf32, #tpu.memory_space<vmem>>, vector<32x128xf32>,
    %c0_28 = arith.constant 0 : index
    %c0_29 = arith.constant 0 : index
    %35 = vector.load %arg11[%c0_28, %c0_29] : memref<32x128xf32, #tpu.memory_space<vmem>>, vector<32x128xf32>
    %c1 = arith.constant 1 : index
    %c0_30 = arith.constant 0 : index
    %c0_31 = arith.constant 0 : index
    %36 = vector.load %arg4[%c1, %c0_30, %c0_31] : memref<4x32x32xbf16, #tpu.memory_space<vmem>>, vector<1x32x32xbf16>
    %37 = vector.shape_cast %36 : vector<1x32x32xbf16> to vector<32x32xbf16>
    %38 = arith.truncf %35 : vector<32x128xf32> to vector<32x128xbf16>
    %cst_32 = arith.constant dense<0.000000e+00> : vector<32x128xf32>
    %39 = tpu.matmul %37, %38, %cst_32 {dimension_numbers = #tpu.dot_dimension_numbers<[1], [0], [0], [1], [0, 0, 1, 1], [], []>} : vector<32x32xbf16>, vector<32x128xbf16>, vector<32x128xf32> -> vector<32x128xf32>
    %c1_33 = arith.constant 1 : index
    %c0_34 = arith.constant 0 : index
    %c0_35 = arith.constant 0 : index
    %40 = vector.load %arg5[%c1_33, %c0_34, %c0_35] : memref<4x32x1xf32, #tpu.memory_space<vmem>>, vector<1x32x1xf32>
    %41 = vector.shape_cast %40 : vector<1x32x1xf32> to vector<32x1xf32>
    %42 = vector.broadcast %41 : vector<32x1xf32> to vector<32x128xf32>
    %43 = arith.addf %39, %42 : vector<32x128xf32>
    %cst_36 = arith.constant 5.000000e-01 : f32
    %44 = vector.broadcast %cst_36 : f32 to vector<32x128xf32>
    %45 = arith.mulf %44, %43 : vector<32x128xf32>
    %cst_37 = arith.constant 0.707106769 : f32
    %46 = vector.broadcast %cst_37 : f32 to vector<32x128xf32>
    %47 = arith.mulf %43, %46 : vector<32x128xf32>
    %48 = math.erf %47 : vector<32x128xf32>
    %cst_38 = arith.constant 1.000000e+00 : f32
    %49 = vector.broadcast %cst_38 : f32 to vector<32x128xf32>
    %50 = arith.addf %49, %48 : vector<32x128xf32>
    %51 = arith.mulf %45, %50 : vector<32x128xf32>
    %c1_39 = arith.constant 1 : index
    %c0_40 = arith.constant 0 : index
    %c0_41 = arith.constant 0 : index
    %52 = vector.load %arg6[%c1_39, %c0_40, %c0_41] : memref<4x32x32xbf16, #tpu.memory_space<vmem>>, vector<1x32x32xbf16>
    %53 = vector.shape_cast %52 : vector<1x32x32xbf16> to vector<32x32xbf16>
    %54 = arith.truncf %51 : vector<32x128xf32> to vector<32x128xbf16>
    %cst_42 = arith.constant dense<0.000000e+00> : vector<32x128xf32>
    %55 = tpu.matmul %53, %54, %cst_42 {dimension_numbers = #tpu.dot_dimension_numbers<[1], [0], [0], [1], [0, 0, 1, 1], [], []>} : vector<32x32xbf16>, vector<32x128xbf16>, vector<32x128xf32> -> vector<32x128xf32>
    %c1_43 = arith.constant 1 : index
    %c0_44 = arith.constant 0 : index
    %c0_45 = arith.constant 0 : index
    %56 = vector.load %arg7[%c1_43, %c0_44, %c0_45] : memref<4x32x1xf32, #tpu.memory_space<vmem>>, vector<1x32x1xf32>
    %57 = vector.shape_cast %56 : vector<1x32x1xf32> to vector<32x1xf32>
    %58 = vector.broadcast %57 : vector<32x1xf32> to vector<32x128xf32>
    %59 = arith.addf %55, %58 : vector<32x128xf32>
    %60 = arith.addf %35, %59 : vector<32x128xf32>
    %c0_46 = arith.constant 0 : index
    %c0_47 = arith.constant 0 : index
    %61 = vector.load %arg11[%c0_46, %c0_47] : memref<32x128xf32, #tpu.memory_space<vmem>>, vector<32x128xf32>
    tpu.vector_store %arg11[%c0_46, %c0_47], %60 {strides = array<i32>} : memref<32x128xf32, #tpu.memory_space<vmem>>, vector<32x128xf32>,
    %c0_48 = arith.constant 0 : index
    %c0_49 = arith.constant 0 : index
    %62 = vector.load %arg11[%c0_48, %c0_49] : memref<32x128xf32, #tpu.memory_space<vmem>>, vector<32x128xf32>
    %c2 = arith.constant 2 : index
    %c0_50 = arith.constant 0 : index
    %c0_51 = arith.constant 0 : index
    %63 = vector.load %arg4[%c2, %c0_50, %c0_51] : memref<4x32x32xbf16, #tpu.memory_space<vmem>>, vector<1x32x32xbf16>
    %64 = vector.shape_cast %63 : vector<1x32x32xbf16> to vector<32x32xbf16>
    %65 = arith.truncf %62 : vector<32x128xf32> to vector<32x128xbf16>
    %cst_52 = arith.constant dense<0.000000e+00> : vector<32x128xf32>
    %66 = tpu.matmul %64, %65, %cst_52 {dimension_numbers = #tpu.dot_dimension_numbers<[1], [0], [0], [1], [0, 0, 1, 1], [], []>} : vector<32x32xbf16>, vector<32x128xbf16>, vector<32x128xf32> -> vector<32x128xf32>
    %c2_53 = arith.constant 2 : index
    %c0_54 = arith.constant 0 : index
    %c0_55 = arith.constant 0 : index
    %67 = vector.load %arg5[%c2_53, %c0_54, %c0_55] : memref<4x32x1xf32, #tpu.memory_space<vmem>>, vector<1x32x1xf32>
    %68 = vector.shape_cast %67 : vector<1x32x1xf32> to vector<32x1xf32>
    %69 = vector.broadcast %68 : vector<32x1xf32> to vector<32x128xf32>
    %70 = arith.addf %66, %69 : vector<32x128xf32>
    %cst_56 = arith.constant 5.000000e-01 : f32
    %71 = vector.broadcast %cst_56 : f32 to vector<32x128xf32>
    %72 = arith.mulf %71, %70 : vector<32x128xf32>
    %cst_57 = arith.constant 0.707106769 : f32
    %73 = vector.broadcast %cst_57 : f32 to vector<32x128xf32>
    %74 = arith.mulf %70, %73 : vector<32x128xf32>
    %75 = math.erf %74 : vector<32x128xf32>
    %cst_58 = arith.constant 1.000000e+00 : f32
    %76 = vector.broadcast %cst_58 : f32 to vector<32x128xf32>
    %77 = arith.addf %76, %75 : vector<32x128xf32>
    %78 = arith.mulf %72, %77 : vector<32x128xf32>
    %c2_59 = arith.constant 2 : index
    %c0_60 = arith.constant 0 : index
    %c0_61 = arith.constant 0 : index
    %79 = vector.load %arg6[%c2_59, %c0_60, %c0_61] : memref<4x32x32xbf16, #tpu.memory_space<vmem>>, vector<1x32x32xbf16>
    %80 = vector.shape_cast %79 : vector<1x32x32xbf16> to vector<32x32xbf16>
    %81 = arith.truncf %78 : vector<32x128xf32> to vector<32x128xbf16>
    %cst_62 = arith.constant dense<0.000000e+00> : vector<32x128xf32>
    %82 = tpu.matmul %80, %81, %cst_62 {dimension_numbers = #tpu.dot_dimension_numbers<[1], [0], [0], [1], [0, 0, 1, 1], [], []>} : vector<32x32xbf16>, vector<32x128xbf16>, vector<32x128xf32> -> vector<32x128xf32>
    %c2_63 = arith.constant 2 : index
    %c0_64 = arith.constant 0 : index
    %c0_65 = arith.constant 0 : index
    %83 = vector.load %arg7[%c2_63, %c0_64, %c0_65] : memref<4x32x1xf32, #tpu.memory_space<vmem>>, vector<1x32x1xf32>
    %84 = vector.shape_cast %83 : vector<1x32x1xf32> to vector<32x1xf32>
    %85 = vector.broadcast %84 : vector<32x1xf32> to vector<32x128xf32>
    %86 = arith.addf %82, %85 : vector<32x128xf32>
    %87 = arith.addf %62, %86 : vector<32x128xf32>
    %c0_66 = arith.constant 0 : index
    %c0_67 = arith.constant 0 : index
    %88 = vector.load %arg11[%c0_66, %c0_67] : memref<32x128xf32, #tpu.memory_space<vmem>>, vector<32x128xf32>
    tpu.vector_store %arg11[%c0_66, %c0_67], %87 {strides = array<i32>} : memref<32x128xf32, #tpu.memory_space<vmem>>, vector<32x128xf32>,
    %c0_68 = arith.constant 0 : index
    %c0_69 = arith.constant 0 : index
    %89 = vector.load %arg11[%c0_68, %c0_69] : memref<32x128xf32, #tpu.memory_space<vmem>>, vector<32x128xf32>
    %c3 = arith.constant 3 : index
    %c0_70 = arith.constant 0 : index
    %c0_71 = arith.constant 0 : index
    %90 = vector.load %arg4[%c3, %c0_70, %c0_71] : memref<4x32x32xbf16, #tpu.memory_space<vmem>>, vector<1x32x32xbf16>
    %91 = vector.shape_cast %90 : vector<1x32x32xbf16> to vector<32x32xbf16>
    %92 = arith.truncf %89 : vector<32x128xf32> to vector<32x128xbf16>
    %cst_72 = arith.constant dense<0.000000e+00> : vector<32x128xf32>
    %93 = tpu.matmul %91, %92, %cst_72 {dimension_numbers = #tpu.dot_dimension_numbers<[1], [0], [0], [1], [0, 0, 1, 1], [], []>} : vector<32x32xbf16>, vector<32x128xbf16>, vector<32x128xf32> -> vector<32x128xf32>
    %c3_73 = arith.constant 3 : index
    %c0_74 = arith.constant 0 : index
    %c0_75 = arith.constant 0 : index
    %94 = vector.load %arg5[%c3_73, %c0_74, %c0_75] : memref<4x32x1xf32, #tpu.memory_space<vmem>>, vector<1x32x1xf32>
    %95 = vector.shape_cast %94 : vector<1x32x1xf32> to vector<32x1xf32>
    %96 = vector.broadcast %95 : vector<32x1xf32> to vector<32x128xf32>
    %97 = arith.addf %93, %96 : vector<32x128xf32>
    %cst_76 = arith.constant 5.000000e-01 : f32
    %98 = vector.broadcast %cst_76 : f32 to vector<32x128xf32>
    %99 = arith.mulf %98, %97 : vector<32x128xf32>
    %cst_77 = arith.constant 0.707106769 : f32
    %100 = vector.broadcast %cst_77 : f32 to vector<32x128xf32>
    %101 = arith.mulf %97, %100 : vector<32x128xf32>
    %102 = math.erf %101 : vector<32x128xf32>
    %cst_78 = arith.constant 1.000000e+00 : f32
    %103 = vector.broadcast %cst_78 : f32 to vector<32x128xf32>
    %104 = arith.addf %103, %102 : vector<32x128xf32>
    %105 = arith.mulf %99, %104 : vector<32x128xf32>
    %c3_79 = arith.constant 3 : index
    %c0_80 = arith.constant 0 : index
    %c0_81 = arith.constant 0 : index
    %106 = vector.load %arg6[%c3_79, %c0_80, %c0_81] : memref<4x32x32xbf16, #tpu.memory_space<vmem>>, vector<1x32x32xbf16>
    %107 = vector.shape_cast %106 : vector<1x32x32xbf16> to vector<32x32xbf16>
    %108 = arith.truncf %105 : vector<32x128xf32> to vector<32x128xbf16>
    %cst_82 = arith.constant dense<0.000000e+00> : vector<32x128xf32>
    %109 = tpu.matmul %107, %108, %cst_82 {dimension_numbers = #tpu.dot_dimension_numbers<[1], [0], [0], [1], [0, 0, 1, 1], [], []>} : vector<32x32xbf16>, vector<32x128xbf16>, vector<32x128xf32> -> vector<32x128xf32>
    %c3_83 = arith.constant 3 : index
    %c0_84 = arith.constant 0 : index
    %c0_85 = arith.constant 0 : index
    %110 = vector.load %arg7[%c3_83, %c0_84, %c0_85] : memref<4x32x1xf32, #tpu.memory_space<vmem>>, vector<1x32x1xf32>
    %111 = vector.shape_cast %110 : vector<1x32x1xf32> to vector<32x1xf32>
    %112 = vector.broadcast %111 : vector<32x1xf32> to vector<32x128xf32>
    %113 = arith.addf %109, %112 : vector<32x128xf32>
    %114 = arith.addf %89, %113 : vector<32x128xf32>
    %c0_86 = arith.constant 0 : index
    %c0_87 = arith.constant 0 : index
    %115 = vector.load %arg11[%c0_86, %c0_87] : memref<32x128xf32, #tpu.memory_space<vmem>>, vector<32x128xf32>
    tpu.vector_store %arg11[%c0_86, %c0_87], %114 {strides = array<i32>} : memref<32x128xf32, #tpu.memory_space<vmem>>, vector<32x128xf32>,
    %c0_88 = arith.constant 0 : index
    %c0_89 = arith.constant 0 : index
    %116 = vector.load %arg11[%c0_88, %c0_89] : memref<32x128xf32, #tpu.memory_space<vmem>>, vector<32x128xf32>
    %c0_90 = arith.constant 0 : index
    %c0_91 = arith.constant 0 : index
    %117 = vector.load %arg8[%c0_90, %c0_91] : memref<32x1xf32, #tpu.memory_space<vmem>>, vector<32x1xf32>
    %118 = vector.broadcast %117 : vector<32x1xf32> to vector<32x128xf32>
    %119 = arith.mulf %116, %118 : vector<32x128xf32>
    %cst_92 = arith.constant dense<0.000000e+00> : vector<128xf32>
    %120 = vector.multi_reduction <add>, %119, %cst_92 [0] : vector<32x128xf32> to vector<128xf32>
    %121 = vector.shape_cast %120 : vector<128xf32> to vector<1x128xf32>
    %c0_93 = arith.constant 0 : index
    %c0_94 = arith.constant 0 : index
    %122 = vector.load %arg9[%c0_93, %c0_94] : memref<1x1xf32, #tpu.memory_space<vmem>>, vector<1x1xf32>
    %123 = vector.broadcast %122 : vector<1x1xf32> to vector<1x128xf32>
    %124 = arith.addf %121, %123 : vector<1x128xf32>
    %c0_95 = arith.constant 0 : index
    %c0_96 = arith.constant 0 : index
    %125 = vector.load %arg10[%c0_95, %c0_96] : memref<1x128xf32, #tpu.memory_space<vmem>>, vector<1x128xf32>
    tpu.vector_store %arg10[%c0_95, %c0_96], %124 {strides = array<i32>} : memref<1x128xf32, #tpu.memory_space<vmem>>, vector<1x128xf32>,
    return
  }
  func.func @transform_0(%arg0: i32) -> (i32, i32) {
    %c0_i32 = arith.constant 0 : i32
    %c0_i32_0 = arith.constant 0 : i32
    return %c0_i32, %arg0 : i32, i32
  }
  func.func @transform_1(%arg0: i32) -> (i32, i32) {
    %c0_i32 = arith.constant 0 : i32
    %c0_i32_0 = arith.constant 0 : i32
    %c0_i32_1 = arith.constant 0 : i32
    return %c0_i32, %c0_i32_0 : i32, i32
  }
  func.func @transform_2(%arg0: i32) -> (i32, i32) {
    %c0_i32 = arith.constant 0 : i32
    %c0_i32_0 = arith.constant 0 : i32
    %c0_i32_1 = arith.constant 0 : i32
    return %c0_i32, %c0_i32_0 : i32, i32
  }
  func.func @transform_3(%arg0: i32) -> (i32, i32, i32) {
    %c0_i32 = arith.constant 0 : i32
    %c0_i32_0 = arith.constant 0 : i32
    %c0_i32_1 = arith.constant 0 : i32
    %c0_i32_2 = arith.constant 0 : i32
    return %c0_i32, %c0_i32_0, %c0_i32_1 : i32, i32, i32
  }
  func.func @transform_4(%arg0: i32) -> (i32, i32, i32) {
    %c0_i32 = arith.constant 0 : i32
    %c0_i32_0 = arith.constant 0 : i32
    %c0_i32_1 = arith.constant 0 : i32
    %c0_i32_2 = arith.constant 0 : i32
    return %c0_i32, %c0_i32_0, %c0_i32_1 : i32, i32, i32
  }
  func.func @transform_5(%arg0: i32) -> (i32, i32, i32) {
    %c0_i32 = arith.constant 0 : i32
    %c0_i32_0 = arith.constant 0 : i32
    %c0_i32_1 = arith.constant 0 : i32
    %c0_i32_2 = arith.constant 0 : i32
    return %c0_i32, %c0_i32_0, %c0_i32_1 : i32, i32, i32
  }
  func.func @transform_6(%arg0: i32) -> (i32, i32, i32) {
    %c0_i32 = arith.constant 0 : i32
    %c0_i32_0 = arith.constant 0 : i32
    %c0_i32_1 = arith.constant 0 : i32
    %c0_i32_2 = arith.constant 0 : i32
    return %c0_i32, %c0_i32_0, %c0_i32_1 : i32, i32, i32
  }
  func.func @transform_7(%arg0: i32) -> (i32, i32) {
    %c0_i32 = arith.constant 0 : i32
    %c0_i32_0 = arith.constant 0 : i32
    %c0_i32_1 = arith.constant 0 : i32
    return %c0_i32, %c0_i32_0 : i32, i32
  }
  func.func @transform_8(%arg0: i32) -> (i32, i32) {
    %c0_i32 = arith.constant 0 : i32
    %c0_i32_0 = arith.constant 0 : i32
    %c0_i32_1 = arith.constant 0 : i32
    return %c0_i32, %c0_i32_0 : i32, i32
  }
  func.func @transform_9(%arg0: i32) -> (i32, i32) {
    %c0_i32 = arith.constant 0 : i32
    %c0_i32_0 = arith.constant 0 : i32
    return %arg0, %c0_i32 : i32, i32
  }
}

</mosaic_0001>

<bundles_post_ra>
// kernel: tpu_custom_call.1
= control target key start
LH: loop header
LB: loop body
LE: loop exit
PB: predicated region body
PF: predicated region fallthrough
CT: control target
= control target key end

     0   :  { %s2562_s0 = inlined_call_operand.vmem [shape: f32[32,128], index: 0, kind: input, shape index: {}]   ;;  %s2563_s1 = inlined_call_operand.vmem [shape: bf16[32,32], index: 1, kind: input, shape index: {}]   ;;  %s2564_s2 = inlined_call_operand.vmem [shape: f32[32,1], index: 2, kind: input, shape index: {}]   ;;  %s2565_s3 = inlined_call_operand.vmem [shape: bf16[4,32,32], index: 3, kind: input, shape index: {}]   ;;  %s2566_s4 = inlined_call_operand.vmem [shape: f32[4,32,1], index: 4, kind: input, shape index: {}]   ;;  %s2567_s5 = inlined_call_operand.vmem [shape: bf16[4,32,32], index: 5, kind: input, shape index: {}]   ;;  %s2568_s6 = inlined_call_operand.vmem [shape: f32[4,32,1], index: 6, kind: input, shape index: {}]   ;;  %s2569_s7 = inlined_call_operand.vmem [shape: f32[32,1], index: 7, kind: input, shape index: {}]   ;;  %s2570_s8 = inlined_call_operand.<no memory space> [shape: f32[1,1], index: 8, kind: input, shape index: {}]   ;;  %s2571_s9 = inlined_call_operand.hbm [shape: f32[1,128], index: 9, kind: output, shape index: {}]  }
   0x1   :  { %v14_v0 = vstv %s2570_s8 }
   0x2   :  { %15 = vst [vmem:[#allocation3] sm:$0x1] %v14_v0 }
   0x3   :  { %v48_v1 = vld [vmem:[%s2564_s2 + $0x10] sm:$0xff]  ;;  %v46_v2 = vld [vmem:[%s2564_s2] sm:$0xff]  ;;  %v1697_v4 = vmov 0   ;;  %v43_v5 = vld [vmem:[%s2562_s0 + $0x18] sm:$0xff] }
   0x4   :  { %v42_v3 = vld [vmem:[%s2562_s0 + $0x10] sm:$0xff]  ;;  %1637 = vset.pattern.permute.xlu1 %v1697_v4  ;;  %1636 = vset.pattern.permute.xlu0 %v1697_v4  ;;  %v40_v6 = vld [vmem:[%s2562_s0] sm:$0xff]  ;;  %v41_v7 = vld [vmem:[%s2562_s0 + $0x8] sm:$0xff] }
   0x5   :  { %62 = vperm.xlu0 %1636, %v48_v1   ;;  %52 = vperm.xlu1 %1637, %v46_v2   ;;  %v45_v8 = vpack.c.bf16 %v43_v5, %v42_v3  ;;  %v44_v9 = vpack.c.bf16 %v41_v7, %v40_v6 }
   0x6   :  { %1638 = vset.pattern.permute.xlu2 %v1697_v4 }
   0x7   :  { %93 = vmatpush.bf16.msra.mxu0 %v45_v8  ;;  %1632 = vmatpush.bf16.msra.mxu1 %v45_v8 }
   0x8   :  { %16 = vsyncpa [#allocation5], 0  ;;  %v49_v10 = vld [vmem:[%s2564_s2 + $0x18] sm:$0xff]  ;;  %v47_v11 = vld [vmem:[%s2564_s2 + $0x8] sm:$0xff]  ;;  %vm80_vm0 = vcmask 261120   ;;  %s1451_s29 = sshll.u32 %s2571_s9, 4  ;;  %s1452_s29 = int_to_ptr.hbm [resolvable:$true] %s1451_s29 }
   0x9   :  { %v1614_v12 = vld [vmem:[%s2563_s1] sm:$0xff]  ;;  %v1615_v13 = vld [vmem:[%s2563_s1 + $0x8] sm:$0xff]  ;;  %v364_v16 = vld [vmem:[%s2568_s6 + $0x18] sm:$0xff] }
   0xa   :  { %v120_v14 = vld [vmem:[%s2566_s4] sm:$0xff]  ;;  %v121_v15 = vld [vmem:[%s2566_s4 + $0x8] sm:$0xff]  ;;  %v1500_v18 = vld [vmem:[%s2566_s4 + $0x30] sm:$0xff] }
   0xb   :  { %94 = vmatpush.bf16.msra.mxu0 %v44_v9  ;;  %1633 = vmatpush.bf16.msra.mxu1 %v44_v9  ;;  %v361_v17 = vld [vmem:[%s2568_s6] sm:$0xff]  ;;  %v1501_v19 = vld [vmem:[%s2566_s4 + $0x38] sm:$0xff]  ;;  %v1499_v20 = vld [vmem:[%s2566_s4 + $0x28] sm:$0xff] }
   0xc   :  { %v1522_v21 = vld [vmem:[%s2568_s6 + $0x30] sm:$0xff]  ;;  %v1520_v22 = vld [vmem:[%s2568_s6 + $0x20] sm:$0xff]  ;;  %v1521_v23 = vld [vmem:[%s2568_s6 + $0x28] sm:$0xff] }
   0xd   :  { %67 = vperm.xlu0 %1636, %v49_v10   ;;  %57 = vperm.xlu1 %1637, %v47_v11   ;;  %v1541_v24 = vld [vmem:[%s2566_s4 + $0x58] sm:$0xff]  ;;  %v1538_v25 = vld [vmem:[%s2566_s4 + $0x40] sm:$0xff]  ;;  %v1562_v26 = vld [vmem:[%s2568_s6 + $0x50] sm:$0xff] }
   0xe   :  { %1468 = vmatmul.msk.bf16.vlgmr.msra.gmra.mxu0 %vm80_vm0, %v1614_v12  ;;  %1469 = vmatmul.msk.bf16.vlgmr.msra.gmra.mxu1 %vm80_vm0, %v1615_v13  ;;  %v1563_v27 = vld [vmem:[%s2568_s6 + $0x58] sm:$0xff]  ;;  %v1561_v28 = vld [vmem:[%s2568_s6 + $0x48] sm:$0xff]  ;;  %v1580_v29 = vld [vmem:[%s2566_s4 + $0x70] sm:$0xff] }
   0xf   :  { %v122_v30 = vld [vmem:[%s2566_s4 + $0x10] sm:$0xff]  ;;  %v1578_v31 = vld [vmem:[%s2566_s4 + $0x60] sm:$0xff]  ;;  %v1579_v32 = vld [vmem:[%s2566_s4 + $0x68] sm:$0xff] }
  0x10   :  { %136 = vperm.xlu2 %1638, %v122_v30   ;;  %v123_v33 = vld [vmem:[%s2566_s4 + $0x18] sm:$0xff]  ;;  %v1601_v34 = vld [vmem:[%s2568_s6 + $0x68] sm:$0xff]  ;;  %v1602_v35 = vld [vmem:[%s2568_s6 + $0x70] sm:$0xff] }
  0x11   :  { %v363_v36 = vld [vmem:[%s2568_s6 + $0x10] sm:$0xff]  ;;  %v1398_v37 = vld [vmem:[%s2569_s7] sm:$0xff]  ;;  %v1399_v38 = vld [vmem:[%s2569_s7 + $0x8] sm:$0xff] }
  0x12   :  { %v362_v39 = vld [vmem:[%s2568_s6 + $0x8] sm:$0xff]  ;;  %v1401_v40 = vld [vmem:[%s2569_s7 + $0x18] sm:$0xff]  ;;  %v1435_v41 = vld [vmem:[#allocation3] sm:$0x1] }
  0x13   :  { %v1498_v42 = vld [vmem:[%s2566_s4 + $0x20] sm:$0xff]  ;;  %v1523_v43 = vld [vmem:[%s2568_s6 + $0x38] sm:$0xff]  ;;  %v1540_v44 = vld [vmem:[%s2566_s4 + $0x50] sm:$0xff] }
  0x14   :  { %v1539_v45 = vld [vmem:[%s2566_s4 + $0x48] sm:$0xff]  ;;  %v1560_v50 = vld [vmem:[%s2568_s6 + $0x40] sm:$0xff]  ;;  %v1581_v59 = vld [vmem:[%s2566_s4 + $0x78] sm:$0xff] }
  0x15   :  { %126 = vperm.xlu0 %1636, %v120_v14   ;;  %131 = vperm.xlu1 %1637, %v121_v15   ;;  %v1616_v62 = vld [vmem:[%s2565_s3] sm:$0xff]  ;;  %v1603_v0 = vld [vmem:[%s2568_s6 + $0x78] sm:$0xff]  ;;  %v1617_v1 = vld [vmem:[%s2565_s3 + $0x8] sm:$0xff] }
  0x16   :  { %v1600_v63 = vld [vmem:[%s2568_s6 + $0x60] sm:$0xff]  ;;  %v1400_v2 = vld [vmem:[%s2569_s7 + $0x10] sm:$0xff] }
  0x18   :  { %141 = vperm.xlu2 %1638, %v123_v33  }
  0x1d   :  { %382 = vperm.xlu0 %1636, %v364_v16   ;;  %367 = vperm.xlu1 %1637, %v361_v17  }
  0x20   :  { %377 = vperm.xlu2 %1638, %v363_v36  }
  0x25   :  { %456 = vperm.xlu0 %1636, %v1500_v18   ;;  %461 = vperm.xlu1 %1637, %v1501_v19  }
  0x28   :  { %372 = vperm.xlu2 %1638, %v362_v39  }
  0x2d   :  { %451 = vperm.xlu0 %1636, %v1499_v20   ;;  %699 = vperm.xlu1 %1637, %v1522_v21  }
  0x30   :  { %446 = vperm.xlu2 %1638, %v1498_v42  }
  0x35   :  { %689 = vperm.xlu0 %1636, %v1520_v22   ;;  %694 = vperm.xlu1 %1637, %v1521_v23  }
  0x38   :  { %704 = vperm.xlu2 %1638, %v1523_v43  }
  0x3d   :  { %783 = vperm.xlu0 %1636, %v1541_v24   ;;  %768 = vperm.xlu1 %1637, %v1538_v25  }
  0x40   :  { %778 = vperm.xlu2 %1638, %v1540_v44  }
  0x45   :  { %1021 = vperm.xlu0 %1636, %v1562_v26   ;;  %1026 = vperm.xlu1 %1637, %v1563_v27  }
  0x48   :  { %773 = vperm.xlu2 %1638, %v1539_v45  }
  0x4d   :  { %1016 = vperm.xlu0 %1636, %v1561_v28   ;;  %1100 = vperm.xlu1 %1637, %v1580_v29  }
  0x50   :  { %1011 = vperm.xlu2 %1638, %v1560_v50  }
  0x55   :  { %1090 = vperm.xlu0 %1636, %v1578_v31   ;;  %1095 = vperm.xlu1 %1637, %v1579_v32  }
  0x58   :  { %1105 = vperm.xlu2 %1638, %v1581_v59  }
  0x5d   :  { %1338 = vperm.xlu0 %1636, %v1601_v34   ;;  %1343 = vperm.xlu1 %1637, %v1602_v35  }
  0x60   :  { %1333 = vperm.xlu2 %1638, %v1600_v63  }
  0x65   :  { %1404 = vperm.xlu0 %1636, %v1398_v37   ;;  %1409 = vperm.xlu1 %1637, %v1399_v38  }
  0x68   :  { %1348 = vperm.xlu2 %1638, %v1603_v0  }
  0x6a   :  { %v137_v16 = vpop.permute.xlu2 %136 }
  0x6d   :  { %1419 = vperm.xlu0 %1636, %v1401_v40   ;;  %1438 = vperm.xlu1 %1637, %v1435_v41  }
  0x70   :  { %1414 = vperm.xlu2 %1638, %v1400_v2  }
  0x72   :  { %v142_v32 = vpop.permute.xlu2 %141 }
  0x77   :  { %v63_v46 = vpop.permute.xlu0 %62  ;;  %v53_v47 = vpop.permute.xlu1 %52 }
  0x7f   :  { %v68_v51 = vpop.permute.xlu0 %67  ;;  %v58_v56 = vpop.permute.xlu1 %57 }
  0x87   :  { %v127_v3 = vpop.permute.xlu0 %126  ;;  %v132_v9 = vpop.permute.xlu1 %131 }
  0x8b   :  { %v96_v48 = vpop.f32.mrf.mxu0  ;;  %v101_v49 = vpop.f32.mrf.mxu1 }
  0x8c   :  { %v1880_v54 = vadd.f32 %v101_v49, %v63_v46  ;;  %v1891_v60 = vadd.f32 %v96_v48, %v53_v47 }
  0x93   :  { %v98_v52 = vpop.f32.mrf.mxu0  ;;  %v103_v53 = vpop.f32.mrf.mxu1 }
  0x94   :  { %v1882_v55 = vadd.f32 %v103_v53, %v68_v51  ;;  %v1884_v57 = vadd.f32 %v98_v52, %v58_v56 }
  0x96   :  { %v119_v58 = vpack.c.bf16 %v1882_v55, %v1880_v54  ;;  %v118_v61 = vpack.c.bf16 %v1884_v57, %v1891_v60 }
  0x98   :  { %166 = vmatpush.bf16.msrb.mxu1 %v119_v58 }
  0x9c   :  { %167 = vmatpush.bf16.msrb.mxu1 %v118_v61 }
  0x9f   :  { %1478 = vmatmul.msk.bf16.vlgmr.msrb.gmra.mxu1 %vm80_vm0, %v1616_v62 }
  0xaf   :  { %1479 = vmatmul.msk.bf16.gmra.mxu1 %vm80_vm0, %v1617_v1 }
 0x11c   :  { %v169_v4 = vpop.f32.mrf.mxu1 }
 0x11d   :  { %v1912_v5 = vadd.f32 %v169_v4, %v127_v3 }
 0x11f   :  { %v1915_v6 = vmul.f32 0.70710677, %v1912_v5 }
 0x121   :  { %v187_v7 = vmul.f32 %v1915_v6, %v1915_v6 }
 0x123   :  { %v1919_v8 = vmin.f32 %v187_v7, 16.0 }
 0x124   :  { %v171_v10 = vpop.f32.mrf.mxu1 }
 0x125   :  { %v1921_v11 = vadd.f32 %v171_v10, %v132_v9  ;;  %v200_v12 = vmul.f32 3.8918573e-05, %v1919_v8  ;;  %v189_v30 = vmul.f32 2.1237322e-06, %v1919_v8 }
 0x127   :  { %v1925_v13 = vmul.f32 0.70710677, %v1921_v11  ;;  %v201_v14 = vadd.f32 0.001143296, %v200_v12  ;;  %v190_v41 = vadd.f32 0.00028619796, %v189_v30 }
 0x129   :  { %v227_v15 = vmul.f32 %v1925_v13, %v1925_v13  ;;  %v202_v17 = vmul.f32 %v201_v14, %v1919_v8  ;;  %v191_v50 = vmul.f32 %v190_v41, %v1919_v8 }
 0x12b   :  { %v1930_v18 = vmin.f32 %v227_v15, 16.0  ;;  %v203_v20 = vadd.f32 0.014752088, %v202_v17  ;;  %v192_v0 = vadd.f32 0.0036580483, %v191_v50 }
 0x12c   :  { %v174_v19 = vpop.f32.mrf.mxu1 }
 0x12d   :  { %v1932_v21 = vadd.f32 %v174_v19, %v137_v16  ;;  %v240_v22 = vmul.f32 3.8918573e-05, %v1930_v18  ;;  %v204_v23 = vmul.f32 %v203_v20, %v1919_v8  ;;  %v229_v31 = vmul.f32 2.1237322e-06, %v1930_v18 }
 0x12e   :  { %v193_v15 = vmul.f32 %v192_v0, %v1919_v8 }
 0x12f   :  { %v1937_v24 = vmul.f32 0.70710677, %v1932_v21  ;;  %v205_v25 = vadd.f32 0.112945676, %v204_v23  ;;  %v241_v26 = vadd.f32 0.001143296, %v240_v22 }
 0x130   :  { %v230_v42 = vadd.f32 0.00028619796, %v229_v31 }
 0x131   :  { %v267_v27 = vmul.f32 %v1937_v24, %v1937_v24  ;;  %v206_v28 = vmul.f32 %v205_v25, %v1919_v8  ;;  %v242_v29 = vmul.f32 %v241_v26, %v1930_v18 }
 0x132   :  { %v231_v51 = vmul.f32 %v230_v42, %v1930_v18 }
 0x133   :  { %v1945_v33 = vmin.f32 %v267_v27, 16.0  ;;  %v243_v35 = vadd.f32 0.014752088, %v242_v29  ;;  %v207_v37 = vadd.f32 0.4994258, %v206_v28 }
 0x134   :  { %v176_v34 = vpop.f32.mrf.mxu1  ;;  %v232_v1 = vadd.f32 0.0036580483, %v231_v51  ;;  %v194_v28 = vadd.f32 0.05243302, %v193_v15 }
 0x135   :  { %v1947_v36 = vadd.f32 %v176_v34, %v142_v32  ;;  %v269_v38 = vmul.f32 2.1237322e-06, %v1945_v33  ;;  %v280_v39 = vmul.f32 3.8918573e-05, %v1945_v33  ;;  %v244_v40 = vmul.f32 %v243_v35, %v1930_v18 }
 0x136   :  { %v208_v46 = vmul.f32 %v207_v37, %v1919_v8  ;;  %v233_v19 = vmul.f32 %v232_v1, %v1930_v18 }
 0x137   :  { %v270_v43 = vadd.f32 0.00028619796, %v269_v38  ;;  %v1953_v44 = vmul.f32 0.70710677, %v1947_v36  ;;  %v281_v45 = vadd.f32 0.001143296, %v280_v39  ;;  %v195_v39 = vmul.f32 %v194_v28, %v1919_v8 }
 0x138   :  { %v245_v47 = vadd.f32 0.112945676, %v244_v40  ;;  %v1964_v58 = vadd.f32 1.0, %v208_v46  ;;  %v234_v30 = vadd.f32 0.05243302, %v233_v19 }
 0x139   :  { %v307_v48 = vmul.f32 %v1953_v44, %v1953_v44  ;;  %v282_v49 = vmul.f32 %v281_v45, %v1945_v33  ;;  %v271_v52 = vmul.f32 %v270_v43, %v1945_v33 }
 0x13a   :  { %v246_v59 = vmul.f32 %v245_v47, %v1930_v18  ;;  %1639 = vrcp.f32 %v1964_v58  ;;  %v235_v41 = vmul.f32 %v234_v30, %v1930_v18  ;;  %vm215_vm1 = vweird.f32 %v1964_v58 }
 0x13b   :  { %v1962_v53 = vmin.f32 %v307_v48, 16.0  ;;  %v283_v56 = vadd.f32 0.014752088, %v282_v49  ;;  %v272_v3 = vadd.f32 0.0036580483, %v271_v52 }
 0x13c   :  { %v247_v2 = vadd.f32 0.4994258, %v246_v59  ;;  %v196_v49 = vadd.f32 0.18741608, %v195_v39  ;;  %v236_v52 = vadd.f32 0.18741608, %v235_v41 }
 0x13d   :  { %v309_v61 = vmul.f32 2.1237322e-06, %v1962_v53  ;;  %v284_v62 = vmul.f32 %v283_v56, %v1945_v33  ;;  %v320_v63 = vmul.f32 3.8918573e-05, %v1962_v53  ;;  %v273_v20 = vmul.f32 %v272_v3, %v1945_v33 }
 0x13e   :  { %v248_v10 = vmul.f32 %v247_v2, %v1930_v18  ;;  %v197_v1 = vmul.f32 %v196_v49, %v1919_v8  ;;  %v237_v3 = vmul.f32 %v236_v52, %v1930_v18 }
 0x13f   :  { %v310_v4 = vadd.f32 0.00028619796, %v309_v61  ;;  %v285_v7 = vadd.f32 0.112945676, %v284_v62  ;;  %v321_v9 = vadd.f32 0.001143296, %v320_v63 }
 0x140   :  { %v1976_v17 = vadd.f32 1.0, %v248_v10  ;;  %v1982_v27 = vpop.eup %1639  ;;  %v274_v31 = vadd.f32 0.05243302, %v273_v20  ;;  %v238_v20 = vadd.f32 1.1283791, %v237_v3 }
 0x141   :  { %v311_v12 = vmul.f32 %v310_v4, %v1962_v53  ;;  %v286_v14 = vmul.f32 %v285_v7, %v1945_v33  ;;  %v322_v16 = vmul.f32 %v321_v9, %v1962_v53  ;;  %v211_v37 = vmul.f32 %v1982_v27, %v1964_v58 }
 0x142   :  { %1641 = vrcp.f32 %v1976_v17  ;;  %v275_v42 = vmul.f32 %v274_v31, %v1945_v33  ;;  %vm216_vm2 = vweird.f32 %v1982_v27  ;;  %v219_v7 = vand.u32 2147483647, %v1964_v58 }
 0x143   :  { %v287_v22 = vadd.f32 0.4994258, %v286_v14  ;;  %v312_v23 = vadd.f32 0.0036580483, %v311_v12  ;;  %v323_v25 = vadd.f32 0.014752088, %v322_v16  ;;  %vm2014_vm6 = vmor %vm215_vm1, %vm216_vm2  ;;  %vm255_vm8 = vweird.f32 %v1976_v17 }
 0x144   :  { %v212_v47 = vsub.f32 1.0, %v211_v37  ;;  %v276_v56 = vadd.f32 0.18741608, %v275_v42  ;;  %v261_v19 = vand.u32 2147483648, %v1976_v17  ;;  %vm220_vm11 = vcmp.eq.f32.partialorder %v219_v7, 8.507059e+37 }
 0x145   :  { %v288_v26 = vmul.f32 %v287_v22, %v1945_v33  ;;  %v324_v29 = vmul.f32 %v323_v25, %v1962_v53  ;;  %v313_v34 = vmul.f32 %v312_v23, %v1962_v53  ;;  %v259_v23 = vand.u32 2147483647, %v1976_v17 }
 0x146   :  { %v213_v63 = vmul.f32 %v1982_v27, %v212_v47  ;;  %v277_v4 = vmul.f32 %v276_v56, %v1945_v33  ;;  %v221_v33 = vand.u32 2147483648, %v1964_v58  ;;  %v239_v37 = vmul.f32 %v238_v20, %v1925_v13 }
 0x147   :  { %v289_v32 = vadd.f32 1.0, %v288_v26  ;;  %v325_v35 = vadd.f32 0.112945676, %v324_v29  ;;  %v314_v45 = vadd.f32 0.05243302, %v313_v34  ;;  %vm260_vm12 = vcmp.eq.f32.partialorder %v259_v23, 8.507059e+37 }
 0x148   :  { %v1988_v38 = vpop.eup %1641  ;;  %v214_v8 = vadd.f32 %v1982_v27, %v213_v63  ;;  %v278_v22 = vadd.f32 1.1283791, %v277_v4  ;;  %v198_v26 = vadd.f32 1.1283791, %v197_v1  ;;  %v222_v34 = vor.u32 1.1754944e-38, %v221_v33  ;;  %v383_v33 = vpop.permute.xlu0 %382 }
 0x149   :  { %1643 = vrcp.f32 %v289_v32  ;;  %v326_v40 = vmul.f32 %v325_v35, %v1962_v53  ;;  %v251_v43 = vmul.f32 %v1988_v38, %v1976_v17  ;;  %v315_v59 = vmul.f32 %v314_v45, %v1962_v53 }
 0x14a   :  { %v301_v12 = vand.u32 2147483648, %v289_v32  ;;  %v299_v14 = vand.u32 2147483647, %v289_v32  ;;  %vm256_vm4 = vweird.f32 %v1988_v38  ;;  %vm295_vm5 = vweird.f32 %v289_v32 }
 0x14b   :  { %v327_v46 = vadd.f32 0.4994258, %v326_v40  ;;  %v252_v48 = vsub.f32 1.0, %v251_v43  ;;  %v316_v9 = vadd.f32 0.18741608, %v315_v59  ;;  %vm2025_vm9 = vmor %vm255_vm8, %vm256_vm4  ;;  %v262_v35 = vor.u32 1.1754944e-38, %v261_v19 }
 0x14c   :  { %v302_v30 = vor.u32 1.1754944e-38, %v301_v12  ;;  %vm300_vm10 = vcmp.eq.f32.partialorder %v299_v14, 8.507059e+37  ;;  %v279_v39 = vmul.f32 %v278_v22, %v1937_v24  ;;  %v199_v47 = vmul.f32 %v198_v26, %v1915_v6  ;;  %v368_v26 = vpop.permute.xlu1 %367 }
 0x14d   :  { %v328_v50 = vmul.f32 %v327_v46, %v1962_v53  ;;  %v253_v0 = vmul.f32 %v1988_v38, %v252_v48  ;;  %v317_v28 = vmul.f32 %v316_v9, %v1962_v53  ;;  %v181_v6 = vmul.f32 0.5, %v1932_v21  ;;  %v1618_v21 = vld [vmem:[%s2567_s5] sm:$0xff] }
 0x14e   :  { %v180_v4 = vmul.f32 0.5, %v1921_v11  ;;  %v1619_v11 = vld [vmem:[%s2567_s5 + $0x8] sm:$0xff] }
 0x14f   :  { %v1644_v51 = vpop.eup %1643  ;;  %v1998_v62 = vadd.f32 1.0, %v328_v50  ;;  %v254_v15 = vadd.f32 %v1988_v38, %v253_v0  ;;  %v318_v41 = vadd.f32 1.1283791, %v317_v28 }
 0x150   :  { %v291_v61 = vmul.f32 %v1644_v51, %v289_v32  ;;  %vm296_vm3 = vweird.f32 %v1644_v51  ;;  %v218_v32 = vsel %vm2014_vm6, %v1982_v27, %v214_v8 }
 0x151   :  { %1645 = vrcp.f32 %v1998_v62  ;;  %vm297_vm7 = vmor %vm295_vm5, %vm296_vm3  ;;  %v258_v17 = vsel %vm2025_vm9, %v1988_v38, %v254_v15  ;;  %v341_v42 = vand.u32 2147483648, %v1998_v62  ;;  %v223_v43 = vsel %vm220_vm11, %v222_v34, %v218_v32 }
 0x152   :  { %v292_v2 = vsub.f32 1.0, %v291_v61  ;;  %v263_v45 = vsel %vm260_vm12, %v262_v35, %v258_v17  ;;  %v339_v38 = vand.u32 2147483647, %v1998_v62  ;;  %vm335_vm14 = vweird.f32 %v1998_v62 }
 0x153   :  { %v264_v13 = vmul.f32 %v263_v45, %v239_v37  ;;  %v342_v24 = vor.u32 1.1754944e-38, %v341_v42  ;;  %v224_v49 = vmul.f32 %v223_v43, %v199_v47  ;;  %v319_v50 = vmul.f32 %v318_v41, %v1953_v44 }
 0x154   :  { %v293_v10 = vmul.f32 %v1644_v51, %v292_v2  ;;  %vm340_vm1 = vcmp.eq.f32.partialorder %v339_v38, 8.507059e+37  ;;  %v182_v2 = vmul.f32 0.5, %v1947_v36 }
 0x155   :  { %v1481_v61 = vclamps-f32 %v264_v13, 1.0  ;;  %v1480_v1 = vclamps-f32 %v224_v49, 1.0 }
 0x156   :  { %v294_v16 = vadd.f32 %v1644_v51, %v293_v10  ;;  %v179_v10 = vmul.f32 0.5, %v1912_v5 }
 0x157   :  { %v1646_v25 = vpop.eup %1645  ;;  %v348_v3 = vadd.f32 1.0, %v1481_v61  ;;  %v347_v44 = vadd.f32 1.0, %v1480_v1 }
 0x158   :  { %v298_v29 = vsel %vm297_vm7, %v1644_v51, %v294_v16  ;;  %v331_v58 = vmul.f32 %v1646_v25, %v1998_v62  ;;  %vm336_vm13 = vweird.f32 %v1646_v25  ;;  %v378_v16 = vpop.permute.xlu2 %377 }
 0x159   :  { %v303_v53 = vsel %vm300_vm10, %v302_v30, %v298_v29  ;;  %vm337_vm15 = vmor %vm335_vm14, %vm336_vm13  ;;  %v352_v14 = vmul.f32 %v348_v3, %v180_v4  ;;  %v351_v8 = vmul.f32 %v347_v44, %v179_v10 }
 0x15a   :  { %v332_v40 = vsub.f32 1.0, %v331_v58  ;;  %v304_v27 = vmul.f32 %v303_v53, %v279_v39 }
 0x15b   :  { %v359_v15 = vpack.c.bf16 %v352_v14, %v351_v8 }
 0x15c   :  { %v333_v46 = vmul.f32 %v1646_v25, %v332_v40  ;;  %v1482_v51 = vclamps-f32 %v304_v27, 1.0 }
 0x15e   :  { %v334_v48 = vadd.f32 %v1646_v25, %v333_v46  ;;  %v349_v0 = vadd.f32 1.0, %v1482_v51 }
 0x160   :  { %v338_v52 = vsel %vm337_vm15, %v1646_v25, %v334_v48  ;;  %v353_v7 = vmul.f32 %v349_v0, %v181_v6  ;;  %v373_v20 = vpop.permute.xlu2 %372  ;;  %v462_v6 = vpop.permute.xlu1 %461 }
 0x161   :  { %v343_v56 = vsel %vm340_vm1, %v342_v24, %v338_v52 }
 0x162   :  { %v344_v59 = vmul.f32 %v343_v56, %v319_v50 }
 0x164   :  { %v1483_v63 = vclamps-f32 %v344_v59, 1.0 }
 0x166   :  { %v350_v62 = vadd.f32 1.0, %v1483_v63 }
 0x168   :  { %v354_v9 = vmul.f32 %v350_v62, %v182_v2 }
 0x16a   :  { %v360_v12 = vpack.c.bf16 %v354_v9, %v353_v7 }
 0x16c   :  { %407 = vmatpush.bf16.msra.mxu2 %v360_v12 }
 0x170   :  { %408 = vmatpush.bf16.msra.mxu2 %v359_v15 }
 0x173   :  { %1492 = vmatmul.msk.bf16.vlgmr.msra.gmra.mxu2 %vm80_vm0, %v1618_v21 }
 0x183   :  { %1493 = vmatmul.msk.bf16.gmra.mxu2 %vm80_vm0, %v1619_v11 }
 0x1f6   :  { %v410_v36 = vpop.f32.mrf.mxu2 }
 0x1f7   :  { %v411_v28 = vadd.f32 %v410_v36, %v368_v26 }
 0x1f9   :  { %v2067_v32 = vadd.f32 %v411_v28, %v1891_v60  ;;  %v447_v60 = vpop.permute.xlu2 %446 }
 0x1fe   :  { %v412_v5 = vpop.f32.mrf.mxu2 }
 0x1ff   :  { %v413_v23 = vadd.f32 %v412_v5, %v373_v20 }
 0x201   :  { %v2062_v31 = vadd.f32 %v413_v23, %v1884_v57  ;;  %v457_v57 = vpop.permute.xlu0 %456 }
 0x203   :  { %v437_v17 = vpack.c.bf16 %v2062_v31, %v2067_v32 }
 0x206   :  { %v415_v18 = vpop.f32.mrf.mxu2 }
 0x207   :  { %v416_v19 = vadd.f32 %v415_v18, %v378_v16 }
 0x209   :  { %v2056_v29 = vadd.f32 %v416_v19, %v1880_v54  ;;  %v1620_v54 = vld [vmem:[%s2565_s3 + $0x10] sm:$0xff]  ;;  %v452_v40 = vpop.permute.xlu0 %451 }
 0x20e   :  { %v417_v22 = vpop.f32.mrf.mxu2 }
 0x20f   :  { %v418_v25 = vadd.f32 %v417_v22, %v383_v33 }
 0x211   :  { %v2059_v30 = vadd.f32 %v418_v25, %v1882_v55  ;;  %v1621_v55 = vld [vmem:[%s2565_s3 + $0x18] sm:$0xff] }
 0x213   :  { %v438_v58 = vpack.c.bf16 %v2059_v30, %v2056_v29 }
 0x215   :  { %486 = vmatpush.bf16.msra.mxu3 %v438_v58 }
 0x219   :  { %487 = vmatpush.bf16.msra.mxu3 %v437_v17 }
 0x21c   :  { %1510 = vmatmul.msk.bf16.vlgmr.msra.gmra.mxu3 %vm80_vm0, %v1620_v54 }
 0x22c   :  { %1511 = vmatmul.msk.bf16.gmra.mxu3 %vm80_vm0, %v1621_v55 }
 0x29f   :  { %v489_v53 = vpop.f32.mrf.mxu3 }
 0x2a0   :  { %v2079_v34 = vadd.f32 %v489_v53, %v447_v60 }
 0x2a2   :  { %v2082_v35 = vmul.f32 0.70710677, %v2079_v34 }
 0x2a4   :  { %v507_v37 = vmul.f32 %v2082_v35, %v2082_v35 }
 0x2a6   :  { %v2086_v39 = vmin.f32 %v507_v37, 16.0 }
 0x2a7   :  { %v491_v41 = vpop.f32.mrf.mxu3 }
 0x2a8   :  { %v2088_v42 = vadd.f32 %v491_v41, %v452_v40  ;;  %v520_v43 = vmul.f32 3.8918573e-05, %v2086_v39  ;;  %v509_v0 = vmul.f32 2.1237322e-06, %v2086_v39 }
 0x2aa   :  { %v2092_v45 = vmul.f32 0.70710677, %v2088_v42  ;;  %v521_v27 = vadd.f32 0.001143296, %v520_v43  ;;  %v510_v12 = vadd.f32 0.00028619796, %v509_v0 }
 0x2ac   :  { %v547_v46 = vmul.f32 %v2092_v45, %v2092_v45  ;;  %v522_v38 = vmul.f32 %v521_v27, %v2086_v39  ;;  %v511_v18 = vmul.f32 %v510_v12, %v2086_v39 }
 0x2ae   :  { %v2097_v47 = vmin.f32 %v547_v46, 16.0  ;;  %v523_v13 = vadd.f32 0.014752088, %v522_v38  ;;  %v512_v17 = vadd.f32 0.0036580483, %v511_v18 }
 0x2af   :  { %v494_v48 = vpop.f32.mrf.mxu3 }
 0x2b0   :  { %v2099_v24 = vadd.f32 %v494_v48, %v457_v57  ;;  %v560_v49 = vmul.f32 3.8918573e-05, %v2097_v47  ;;  %v524_v50 = vmul.f32 %v523_v13, %v2086_v39  ;;  %v549_v1 = vmul.f32 2.1237322e-06, %v2097_v47 }
 0x2b1   :  { %v513_v27 = vmul.f32 %v512_v17, %v2086_v39 }
 0x2b2   :  { %v2104_v51 = vmul.f32 0.70710677, %v2099_v24  ;;  %v525_v52 = vadd.f32 0.112945676, %v524_v50  ;;  %v561_v56 = vadd.f32 0.001143296, %v560_v49 }
 0x2b3   :  { %v550_v14 = vadd.f32 0.00028619796, %v549_v1 }
 0x2b4   :  { %v587_v59 = vmul.f32 %v2104_v51, %v2104_v51  ;;  %v526_v61 = vmul.f32 %v525_v52, %v2086_v39  ;;  %v562_v63 = vmul.f32 %v561_v56, %v2097_v47 }
 0x2b5   :  { %v551_v33 = vmul.f32 %v550_v14, %v2097_v47 }
 0x2b6   :  { %v2112_v2 = vmin.f32 %v587_v59, 16.0  ;;  %v563_v3 = vadd.f32 0.014752088, %v562_v63  ;;  %v527_v7 = vadd.f32 0.4994258, %v526_v61 }
 0x2b7   :  { %v496_v62 = vpop.f32.mrf.mxu3  ;;  %v552_v54 = vadd.f32 0.0036580483, %v551_v33  ;;  %v514_v61 = vadd.f32 0.05243302, %v513_v27 }
 0x2b8   :  { %v2114_v4 = vadd.f32 %v496_v62, %v462_v6  ;;  %v589_v9 = vmul.f32 2.1237322e-06, %v2112_v2  ;;  %v600_v44 = vmul.f32 3.8918573e-05, %v2112_v2  ;;  %v564_v10 = vmul.f32 %v563_v3, %v2097_v47 }
 0x2b9   :  { %v528_v11 = vmul.f32 %v527_v7, %v2086_v39  ;;  %v553_v48 = vmul.f32 %v552_v54, %v2097_v47 }
 0x2ba   :  { %v590_v8 = vadd.f32 0.00028619796, %v589_v9  ;;  %v2120_v15 = vmul.f32 0.70710677, %v2114_v4  ;;  %v601_v21 = vadd.f32 0.001143296, %v600_v44  ;;  %v515_v44 = vmul.f32 %v514_v61, %v2086_v39 }
 0x2bb   :  { %v565_v36 = vadd.f32 0.112945676, %v564_v10  ;;  %v2131_v23 = vadd.f32 1.0, %v528_v11  ;;  %v554_v0 = vadd.f32 0.05243302, %v553_v48 }
 0x2bc   :  { %v627_v5 = vmul.f32 %v2120_v15, %v2120_v15  ;;  %v602_v16 = vmul.f32 %v601_v21, %v2112_v2  ;;  %v591_v19 = vmul.f32 %v590_v8, %v2112_v2 }
 0x2bd   :  { %v566_v25 = vmul.f32 %v565_v36, %v2097_v47  ;;  %1647 = vrcp.f32 %v2131_v23  ;;  %v555_v12 = vmul.f32 %v554_v0, %v2097_v47  ;;  %vm535_vm2 = vweird.f32 %v2131_v23 }
 0x2be   :  { %v2129_v20 = vmin.f32 %v627_v5, 16.0  ;;  %v603_v22 = vadd.f32 0.014752088, %v602_v16  ;;  %v592_v57 = vadd.f32 0.0036580483, %v591_v19 }
 0x2bf   :  { %v567_v55 = vadd.f32 0.4994258, %v566_v25  ;;  %v516_v16 = vadd.f32 0.18741608, %v515_v44  ;;  %v556_v19 = vadd.f32 0.18741608, %v555_v12 }
 0x2c0   :  { %v629_v26 = vmul.f32 2.1237322e-06, %v2129_v20  ;;  %v604_v28 = vmul.f32 %v603_v22, %v2112_v2  ;;  %v640_v58 = vmul.f32 3.8918573e-05, %v2129_v20  ;;  %v593_v13 = vmul.f32 %v592_v57, %v2112_v2 }
 0x2c1   :  { %v568_v40 = vmul.f32 %v567_v55, %v2097_v47  ;;  %v517_v54 = vmul.f32 %v516_v16, %v2086_v39  ;;  %v557_v57 = vmul.f32 %v556_v19, %v2097_v47 }
 0x2c2   :  { %v630_v60 = vadd.f32 0.00028619796, %v629_v26  ;;  %v605_v53 = vadd.f32 0.112945676, %v604_v28  ;;  %v641_v37 = vadd.f32 0.001143296, %v640_v58 }
 0x2c3   :  { %v2143_v38 = vadd.f32 1.0, %v568_v40  ;;  %v2149_v59 = vpop.eup %1647  ;;  %v594_v1 = vadd.f32 0.05243302, %v593_v13  ;;  %v558_v13 = vadd.f32 1.1283791, %v557_v57 }
 0x2c4   :  { %v631_v41 = vmul.f32 %v630_v60, %v2129_v20  ;;  %v606_v43 = vmul.f32 %v605_v53, %v2112_v2  ;;  %v642_v46 = vmul.f32 %v641_v37, %v2129_v20  ;;  %v531_v7 = vmul.f32 %v2149_v59, %v2131_v23 }
 0x2c5   :  { %1649 = vrcp.f32 %v2143_v38  ;;  %v595_v14 = vmul.f32 %v594_v1, %v2112_v2  ;;  %vm536_vm3 = vweird.f32 %v2149_v59  ;;  %v539_v53 = vand.u32 2147483647, %v2131_v23 }
 0x2c6   :  { %v607_v49 = vadd.f32 0.4994258, %v606_v43  ;;  %v632_v50 = vadd.f32 0.0036580483, %v631_v41  ;;  %v643_v52 = vadd.f32 0.014752088, %v642_v46  ;;  %vm2181_vm7 = vmor %vm535_vm2, %vm536_vm3  ;;  %vm575_vm9 = vweird.f32 %v2143_v38 }
 0x2c7   :  { %v532_v36 = vsub.f32 1.0, %v531_v7  ;;  %v596_v22 = vadd.f32 0.18741608, %v595_v14  ;;  %v581_v48 = vand.u32 2147483648, %v2143_v38  ;;  %vm540_vm12 = vcmp.eq.f32.partialorder %v539_v53, 8.507059e+37 }
 0x2c8   :  { %v608_v56 = vmul.f32 %v607_v49, %v2112_v2  ;;  %v644_v63 = vmul.f32 %v643_v52, %v2129_v20  ;;  %v633_v62 = vmul.f32 %v632_v50, %v2129_v20  ;;  %v579_v50 = vand.u32 2147483647, %v2143_v38 }
 0x2c9   :  { %v533_v58 = vmul.f32 %v2149_v59, %v532_v36  ;;  %v597_v60 = vmul.f32 %v596_v22, %v2112_v2  ;;  %v541_v2 = vand.u32 2147483648, %v2131_v23  ;;  %v559_v7 = vmul.f32 %v558_v13, %v2092_v45  ;;  %v705_v13 = vpop.permute.xlu2 %704 }
 0x2ca   :  { %v609_v6 = vadd.f32 1.0, %v608_v56  ;;  %v645_v3 = vadd.f32 0.112945676, %v644_v63  ;;  %v634_v21 = vadd.f32 0.05243302, %v633_v62  ;;  %vm580_vm13 = vcmp.eq.f32.partialorder %v579_v50, 8.507059e+37 }
 0x2cb   :  { %v2155_v9 = vpop.eup %1649  ;;  %v534_v39 = vadd.f32 %v2149_v59, %v533_v58  ;;  %v598_v49 = vadd.f32 1.1283791, %v597_v60  ;;  %v518_v56 = vadd.f32 1.1283791, %v517_v54  ;;  %v542_v62 = vor.u32 1.1754944e-38, %v541_v2 }
 0x2cc   :  { %1651 = vrcp.f32 %v609_v6  ;;  %v646_v10 = vmul.f32 %v645_v3, %v2129_v20  ;;  %v571_v8 = vmul.f32 %v2155_v9, %v2143_v38  ;;  %v635_v25 = vmul.f32 %v634_v21, %v2129_v20 }
 0x2cd   :  { %v621_v41 = vand.u32 2147483648, %v609_v6  ;;  %v619_v43 = vand.u32 2147483647, %v609_v6  ;;  %vm576_vm5 = vweird.f32 %v2155_v9  ;;  %vm615_vm6 = vweird.f32 %v609_v6 }
 0x2ce   :  { %v647_v11 = vadd.f32 0.4994258, %v646_v10  ;;  %v572_v5 = vsub.f32 1.0, %v571_v8  ;;  %v636_v37 = vadd.f32 0.18741608, %v635_v25  ;;  %vm2192_vm10 = vmor %vm575_vm9, %vm576_vm5  ;;  %v582_v3 = vor.u32 1.1754944e-38, %v581_v48 }
 0x2cf   :  { %v622_v0 = vor.u32 1.1754944e-38, %v621_v41  ;;  %vm620_vm11 = vcmp.eq.f32.partialorder %v619_v43, 8.507059e+37  ;;  %v599_v44 = vmul.f32 %v598_v49, %v2104_v51  ;;  %v519_v36 = vmul.f32 %v518_v56, %v2082_v35  ;;  %v690_v56 = vpop.permute.xlu0 %689 }
 0x2d0   :  { %v648_v18 = vmul.f32 %v647_v11, %v2129_v20  ;;  %v573_v17 = vmul.f32 %v2155_v9, %v572_v5  ;;  %v637_v61 = vmul.f32 %v636_v37, %v2129_v20  ;;  %v501_v35 = vmul.f32 0.5, %v2099_v24  ;;  %v1622_v24 = vld [vmem:[%s2567_s5 + $0x10] sm:$0xff] }
 0x2d1   :  { %v500_v60 = vmul.f32 0.5, %v2088_v42  ;;  %v1623_v42 = vld [vmem:[%s2567_s5 + $0x18] sm:$0xff] }
 0x2d2   :  { %v1652_v33 = vpop.eup %1651  ;;  %v2165_v28 = vadd.f32 1.0, %v648_v18  ;;  %v574_v27 = vadd.f32 %v2155_v9, %v573_v17  ;;  %v638_v12 = vadd.f32 1.1283791, %v637_v61 }
 0x2d3   :  { %v611_v26 = vmul.f32 %v1652_v33, %v609_v6  ;;  %vm616_vm4 = vweird.f32 %v1652_v33  ;;  %v538_v6 = vsel %vm2181_vm7, %v2149_v59, %v534_v39 }
 0x2d4   :  { %1653 = vrcp.f32 %v2165_v28  ;;  %vm617_vm8 = vmor %vm615_vm6, %vm616_vm4  ;;  %v578_v38 = vsel %vm2192_vm10, %v2155_v9, %v574_v27  ;;  %v661_v14 = vand.u32 2147483648, %v2165_v28  ;;  %v543_v8 = vsel %vm540_vm12, %v542_v62, %v538_v6 }
 0x2d5   :  { %v612_v55 = vsub.f32 1.0, %v611_v26  ;;  %v583_v21 = vsel %vm580_vm13, %v582_v3, %v578_v38  ;;  %v659_v9 = vand.u32 2147483647, %v2165_v28  ;;  %vm655_vm15 = vweird.f32 %v2165_v28 }
 0x2d6   :  { %v584_v45 = vmul.f32 %v583_v21, %v559_v7  ;;  %v662_v51 = vor.u32 1.1754944e-38, %v661_v14  ;;  %v544_v16 = vmul.f32 %v543_v8, %v519_v36  ;;  %v639_v18 = vmul.f32 %v638_v12, %v2120_v15 }
 0x2d7   :  { %v613_v40 = vmul.f32 %v1652_v33, %v612_v55  ;;  %vm660_vm2 = vcmp.eq.f32.partialorder %v659_v9, 8.507059e+37  ;;  %v502_v55 = vmul.f32 0.5, %v2114_v4 }
 0x2d8   :  { %v1513_v26 = vclamps-f32 %v584_v45, 1.0  ;;  %v1512_v54 = vclamps-f32 %v544_v16, 1.0 }
 0x2d9   :  { %v614_v46 = vadd.f32 %v1652_v33, %v613_v40  ;;  %v499_v40 = vmul.f32 0.5, %v2079_v34 }
 0x2da   :  { %v1654_v52 = vpop.eup %1653  ;;  %v668_v57 = vadd.f32 1.0, %v1513_v26  ;;  %v667_v15 = vadd.f32 1.0, %v1512_v54 }
 0x2db   :  { %v618_v63 = vsel %vm617_vm8, %v1652_v33, %v614_v46  ;;  %v651_v23 = vmul.f32 %v1654_v52, %v2165_v28  ;;  %vm656_vm14 = vweird.f32 %v1654_v52  ;;  %v700_v46 = vpop.permute.xlu1 %699 }
 0x2dc   :  { %v623_v20 = vsel %vm620_vm11, %v622_v0, %v618_v63  ;;  %vm657_vm1 = vmor %vm655_vm15, %vm656_vm14  ;;  %v672_v43 = vmul.f32 %v668_v57, %v500_v60  ;;  %v671_v39 = vmul.f32 %v667_v15, %v499_v40 }
 0x2dd   :  { %v652_v10 = vsub.f32 1.0, %v651_v23  ;;  %v624_v59 = vmul.f32 %v623_v20, %v599_v44 }
 0x2de   :  { %v680_v27 = vpack.c.bf16 %v672_v43, %v671_v39 }
 0x2df   :  { %v653_v11 = vmul.f32 %v1654_v52, %v652_v10  ;;  %v1514_v33 = vclamps-f32 %v624_v59, 1.0 }
 0x2e1   :  { %v654_v5 = vadd.f32 %v1654_v52, %v653_v11  ;;  %v669_v17 = vadd.f32 1.0, %v1514_v33 }
 0x2e3   :  { %v658_v19 = vsel %vm657_vm1, %v1654_v52, %v654_v5  ;;  %v673_v53 = vmul.f32 %v669_v17, %v501_v35  ;;  %v695_v2 = vpop.permute.xlu1 %694  ;;  %v784_v35 = vpop.permute.xlu0 %783 }
 0x2e4   :  { %v663_v22 = vsel %vm660_vm2, %v662_v51, %v658_v19 }
 0x2e5   :  { %v664_v25 = vmul.f32 %v663_v22, %v639_v18 }
 0x2e7   :  { %v1515_v58 = vclamps-f32 %v664_v25, 1.0 }
 0x2e9   :  { %v670_v28 = vadd.f32 1.0, %v1515_v58 }
 0x2eb   :  { %v674_v37 = vmul.f32 %v670_v28, %v502_v55 }
 0x2ed   :  { %v681_v41 = vpack.c.bf16 %v674_v37, %v673_v53 }
 0x2ef   :  { %729 = vmatpush.bf16.msrb.mxu0 %v681_v41 }
 0x2f3   :  { %730 = vmatpush.bf16.msrb.mxu0 %v680_v27 }
 0x2f6   :  { %1532 = vmatmul.msk.bf16.vlgmr.msrb.gmra.mxu0 %vm80_vm0, %v1622_v24 }
 0x306   :  { %1533 = vmatmul.msk.bf16.gmra.mxu0 %vm80_vm0, %v1623_v42 }
 0x373   :  { %v732_v4 = vpop.f32.mrf.mxu0 }
 0x374   :  { %v733_v61 = vadd.f32 %v732_v4, %v690_v56 }
 0x376   :  { %v2234_v6 = vadd.f32 %v733_v61, %v2067_v32  ;;  %v769_v32 = vpop.permute.xlu1 %768 }
 0x37b   :  { %v734_v34 = vpop.f32.mrf.mxu0 }
 0x37c   :  { %v735_v50 = vadd.f32 %v734_v34, %v695_v2 }
 0x37e   :  { %v2229_v1 = vadd.f32 %v735_v50, %v2062_v31  ;;  %v779_v31 = vpop.permute.xlu2 %778 }
 0x380   :  { %v759_v38 = vpack.c.bf16 %v2229_v1, %v2234_v6 }
 0x383   :  { %v737_v47 = vpop.f32.mrf.mxu0 }
 0x384   :  { %v738_v48 = vadd.f32 %v737_v47, %v700_v46 }
 0x386   :  { %v2223_v63 = vadd.f32 %v738_v48, %v2056_v29  ;;  %v1624_v29 = vld [vmem:[%s2565_s3 + $0x20] sm:$0xff]  ;;  %v774_v10 = vpop.permute.xlu2 %773 }
 0x38b   :  { %v739_v49 = vpop.f32.mrf.mxu0 }
 0x38c   :  { %v740_v52 = vadd.f32 %v739_v49, %v705_v13 }
 0x38e   :  { %v2226_v0 = vadd.f32 %v740_v52, %v2059_v30  ;;  %v1625_v30 = vld [vmem:[%s2565_s3 + $0x28] sm:$0xff] }
 0x390   :  { %v760_v23 = vpack.c.bf16 %v2226_v0, %v2223_v63 }
 0x392   :  { %808 = vmatpush.bf16.msra.mxu1 %v760_v23 }
 0x396   :  { %809 = vmatpush.bf16.msra.mxu1 %v759_v38 }
 0x399   :  { %1550 = vmatmul.msk.bf16.vlgmr.msra.gmra.mxu1 %vm80_vm0, %v1624_v29 }
 0x3a9   :  { %1551 = vmatmul.msk.bf16.gmra.mxu1 %vm80_vm0, %v1625_v30 }
 0x416   :  { %v811_v20 = vpop.f32.mrf.mxu1 }
 0x417   :  { %v2246_v62 = vadd.f32 %v811_v20, %v769_v32 }
 0x419   :  { %v2249_v3 = vmul.f32 0.70710677, %v2246_v62 }
 0x41b   :  { %v829_v7 = vmul.f32 %v2249_v3, %v2249_v3 }
 0x41d   :  { %v2253_v44 = vmin.f32 %v829_v7, 16.0 }
 0x41e   :  { %v813_v12 = vpop.f32.mrf.mxu1 }
 0x41f   :  { %v2255_v14 = vadd.f32 %v813_v12, %v774_v10  ;;  %v842_v8 = vmul.f32 3.8918573e-05, %v2253_v44  ;;  %v831_v17 = vmul.f32 2.1237322e-06, %v2253_v44 }
 0x421   :  { %v2259_v21 = vmul.f32 0.70710677, %v2255_v14  ;;  %v843_v59 = vadd.f32 0.001143296, %v842_v8  ;;  %v832_v41 = vadd.f32 0.00028619796, %v831_v17 }
 0x423   :  { %v869_v11 = vmul.f32 %v2259_v21, %v2259_v21  ;;  %v844_v9 = vmul.f32 %v843_v59, %v2253_v44  ;;  %v833_v47 = vmul.f32 %v832_v41, %v2253_v44 }
 0x425   :  { %v2264_v36 = vmin.f32 %v869_v11, 16.0  ;;  %v845_v45 = vadd.f32 0.014752088, %v844_v9  ;;  %v834_v38 = vadd.f32 0.0036580483, %v833_v47 }
 0x426   :  { %v816_v5 = vpop.f32.mrf.mxu1 }
 0x427   :  { %v2266_v51 = vadd.f32 %v816_v5, %v779_v31  ;;  %v882_v16 = vmul.f32 3.8918573e-05, %v2264_v36  ;;  %v846_v18 = vmul.f32 %v845_v45, %v2253_v44  ;;  %v871_v54 = vmul.f32 2.1237322e-06, %v2264_v36 }
 0x428   :  { %v835_v59 = vmul.f32 %v834_v38, %v2253_v44 }
 0x429   :  { %v2271_v33 = vmul.f32 0.70710677, %v2266_v51  ;;  %v847_v19 = vadd.f32 0.112945676, %v846_v18  ;;  %v883_v22 = vadd.f32 0.001143296, %v882_v16 }
 0x42a   :  { %v872_v43 = vadd.f32 0.00028619796, %v871_v54 }
 0x42b   :  { %v909_v25 = vmul.f32 %v2271_v33, %v2271_v33  ;;  %v848_v26 = vmul.f32 %v847_v19, %v2253_v44  ;;  %v884_v58 = vmul.f32 %v883_v22, %v2264_v36 }
 0x42c   :  { %v873_v2 = vmul.f32 %v872_v43, %v2264_v36 }
 0x42d   :  { %v2279_v55 = vmin.f32 %v909_v25, 16.0  ;;  %v885_v57 = vadd.f32 0.014752088, %v884_v58  ;;  %v849_v53 = vadd.f32 0.4994258, %v848_v26 }
 0x42e   :  { %v818_v28 = vpop.f32.mrf.mxu1  ;;  %v874_v29 = vadd.f32 0.0036580483, %v873_v2  ;;  %v836_v26 = vadd.f32 0.05243302, %v835_v59 }
 0x42f   :  { %v2281_v60 = vadd.f32 %v818_v28, %v784_v35  ;;  %v911_v37 = vmul.f32 2.1237322e-06, %v2279_v55  ;;  %v922_v15 = vmul.f32 3.8918573e-05, %v2279_v55  ;;  %v886_v40 = vmul.f32 %v885_v57, %v2264_v36 }
 0x430   :  { %v850_v42 = vmul.f32 %v849_v53, %v2253_v44  ;;  %v875_v5 = vmul.f32 %v874_v29, %v2264_v36 }
 0x431   :  { %v912_v39 = vadd.f32 0.00028619796, %v911_v37  ;;  %v2287_v27 = vmul.f32 0.70710677, %v2281_v60  ;;  %v923_v24 = vadd.f32 0.001143296, %v922_v15  ;;  %v837_v15 = vmul.f32 %v836_v26, %v2253_v44 }
 0x432   :  { %v887_v4 = vadd.f32 0.112945676, %v886_v40  ;;  %v2298_v50 = vadd.f32 1.0, %v850_v42  ;;  %v876_v17 = vadd.f32 0.05243302, %v875_v5 }
 0x433   :  { %v949_v34 = vmul.f32 %v2287_v27, %v2287_v27  ;;  %v924_v46 = vmul.f32 %v923_v24, %v2279_v55  ;;  %v913_v48 = vmul.f32 %v912_v39, %v2279_v55 }
 0x434   :  { %v888_v52 = vmul.f32 %v887_v4, %v2264_v36  ;;  %1655 = vrcp.f32 %v2298_v50  ;;  %v877_v41 = vmul.f32 %v876_v17, %v2264_v36  ;;  %vm857_vm3 = vweird.f32 %v2298_v50 }
 0x435   :  { %v2296_v13 = vmin.f32 %v949_v34, 16.0  ;;  %v925_v49 = vadd.f32 0.014752088, %v924_v46  ;;  %v914_v31 = vadd.f32 0.0036580483, %v913_v48 }
 0x436   :  { %v889_v30 = vadd.f32 0.4994258, %v888_v52  ;;  %v838_v46 = vadd.f32 0.18741608, %v837_v15  ;;  %v878_v48 = vadd.f32 0.18741608, %v877_v41 }
 0x437   :  { %v951_v56 = vmul.f32 2.1237322e-06, %v2296_v13  ;;  %v926_v61 = vmul.f32 %v925_v49, %v2279_v55  ;;  %v962_v23 = vmul.f32 3.8918573e-05, %v2296_v13  ;;  %v915_v45 = vmul.f32 %v914_v31, %v2279_v55 }
 0x438   :  { %v890_v10 = vmul.f32 %v889_v30, %v2264_v36  ;;  %v839_v29 = vmul.f32 %v838_v46, %v2253_v44  ;;  %v879_v31 = vmul.f32 %v878_v48, %v2264_v36 }
 0x439   :  { %v952_v32 = vadd.f32 0.00028619796, %v951_v56  ;;  %v927_v20 = vadd.f32 0.112945676, %v926_v61  ;;  %v963_v7 = vadd.f32 0.001143296, %v962_v23 }
 0x43a   :  { %v2310_v9 = vadd.f32 1.0, %v890_v10  ;;  %v2316_v25 = vpop.eup %1655  ;;  %v916_v54 = vadd.f32 0.05243302, %v915_v45  ;;  %v880_v45 = vadd.f32 1.1283791, %v879_v31 }
 0x43b   :  { %v953_v12 = vmul.f32 %v952_v32, %v2296_v13  ;;  %v928_v8 = vmul.f32 %v927_v20, %v2279_v55  ;;  %v964_v11 = vmul.f32 %v963_v7, %v2296_v13  ;;  %v853_v53 = vmul.f32 %v2316_v25, %v2298_v50 }
 0x43c   :  { %1657 = vrcp.f32 %v2310_v9  ;;  %v917_v43 = vmul.f32 %v916_v54, %v2279_v55  ;;  %vm858_vm4 = vweird.f32 %v2316_v25  ;;  %v861_v20 = vand.u32 2147483647, %v2298_v50 }
 0x43d   :  { %v929_v16 = vadd.f32 0.4994258, %v928_v8  ;;  %v954_v18 = vadd.f32 0.0036580483, %v953_v12  ;;  %v965_v19 = vadd.f32 0.014752088, %v964_v11  ;;  %vm2348_vm8 = vmor %vm857_vm3, %vm858_vm4  ;;  %vm897_vm10 = vweird.f32 %v2310_v9 }
 0x43e   :  { %v854_v4 = vsub.f32 1.0, %v853_v53  ;;  %v918_v49 = vadd.f32 0.18741608, %v917_v43  ;;  %v903_v5 = vand.u32 2147483648, %v2310_v9  ;;  %vm862_vm13 = vcmp.eq.f32.partialorder %v861_v20, 8.507059e+37 }
 0x43f   :  { %v930_v22 = vmul.f32 %v929_v16, %v2279_v55  ;;  %v966_v58 = vmul.f32 %v965_v19, %v2296_v13  ;;  %v955_v28 = vmul.f32 %v954_v18, %v2296_v13  ;;  %v901_v18 = vand.u32 2147483647, %v2310_v9 }
 0x440   :  { %v855_v23 = vmul.f32 %v2316_v25, %v854_v4  ;;  %v919_v32 = vmul.f32 %v918_v49, %v2279_v55  ;;  %v863_v55 = vand.u32 2147483648, %v2298_v50  ;;  %v881_v53 = vmul.f32 %v880_v45, %v2259_v21 }
 0x441   :  { %v931_v35 = vadd.f32 1.0, %v930_v22  ;;  %v967_v57 = vadd.f32 0.112945676, %v966_v58  ;;  %v956_v24 = vadd.f32 0.05243302, %v955_v28  ;;  %vm902_vm14 = vcmp.eq.f32.partialorder %v901_v18, 8.507059e+37 }
 0x442   :  { %v2322_v37 = vpop.eup %1657  ;;  %v856_v44 = vadd.f32 %v2316_v25, %v855_v23  ;;  %v920_v16 = vadd.f32 1.1283791, %v919_v32  ;;  %v840_v22 = vadd.f32 1.1283791, %v839_v29  ;;  %v864_v28 = vor.u32 1.1754944e-38, %v863_v55  ;;  %v1027_v55 = vpop.permute.xlu1 %1026 }
 0x443   :  { %1659 = vrcp.f32 %v931_v35  ;;  %v968_v40 = vmul.f32 %v967_v57, %v2296_v13  ;;  %v893_v39 = vmul.f32 %v2322_v37, %v2310_v9  ;;  %v957_v52 = vmul.f32 %v956_v24, %v2296_v13 }
 0x444   :  { %v943_v12 = vand.u32 2147483648, %v931_v35  ;;  %v941_v8 = vand.u32 2147483647, %v931_v35  ;;  %vm898_vm6 = vweird.f32 %v2322_v37  ;;  %vm937_vm7 = vweird.f32 %v931_v35 }
 0x445   :  { %v969_v42 = vadd.f32 0.4994258, %v968_v40  ;;  %v894_v34 = vsub.f32 1.0, %v893_v39  ;;  %v958_v7 = vadd.f32 0.18741608, %v957_v52  ;;  %vm2359_vm11 = vmor %vm897_vm10, %vm898_vm6  ;;  %v904_v57 = vor.u32 1.1754944e-38, %v903_v5 }
 0x446   :  { %v944_v17 = vor.u32 1.1754944e-38, %v943_v12  ;;  %vm942_vm12 = vcmp.eq.f32.partialorder %v941_v8, 8.507059e+37  ;;  %v921_v15 = vmul.f32 %v920_v16, %v2271_v33  ;;  %v841_v4 = vmul.f32 %v840_v22, %v2249_v3  ;;  %v1012_v22 = vpop.permute.xlu2 %1011 }
 0x447   :  { %v970_v47 = vmul.f32 %v969_v42, %v2296_v13  ;;  %v895_v38 = vmul.f32 %v2322_v37, %v894_v34  ;;  %v959_v26 = vmul.f32 %v958_v7, %v2296_v13  ;;  %v823_v3 = vmul.f32 0.5, %v2266_v51  ;;  %v1626_v51 = vld [vmem:[%s2567_s5 + $0x20] sm:$0xff] }
 0x448   :  { %v822_v32 = vmul.f32 0.5, %v2255_v14  ;;  %v1627_v14 = vld [vmem:[%s2567_s5 + $0x28] sm:$0xff] }
 0x449   :  { %v1660_v2 = vpop.eup %1659  ;;  %v2332_v61 = vadd.f32 1.0, %v970_v47  ;;  %v896_v59 = vadd.f32 %v2322_v37, %v895_v38  ;;  %v960_v41 = vadd.f32 1.1283791, %v959_v26 }
 0x44a   :  { %v933_v56 = vmul.f32 %v1660_v2, %v931_v35  ;;  %vm938_vm5 = vweird.f32 %v1660_v2  ;;  %v860_v35 = vsel %vm2348_vm8, %v2316_v25, %v856_v44 }
 0x44b   :  { %1661 = vrcp.f32 %v2332_v61  ;;  %vm939_vm9 = vmor %vm937_vm7, %vm938_vm5  ;;  %v900_v9 = vsel %vm2359_vm11, %v2322_v37, %v896_v59  ;;  %v983_v43 = vand.u32 2147483648, %v2332_v61  ;;  %v865_v39 = vsel %vm862_vm13, %v864_v28, %v860_v35 }
 0x44c   :  { %v934_v30 = vsub.f32 1.0, %v933_v56  ;;  %v905_v24 = vsel %vm902_vm14, %v904_v57, %v900_v9  ;;  %v981_v37 = vand.u32 2147483647, %v2332_v61  ;;  %vm977_vm1 = vweird.f32 %v2332_v61 }
 0x44d   :  { %v906_v21 = vmul.f32 %v905_v24, %v881_v53  ;;  %v984_v33 = vor.u32 1.1754944e-38, %v983_v43  ;;  %v866_v46 = vmul.f32 %v865_v39, %v841_v4  ;;  %v961_v47 = vmul.f32 %v960_v41, %v2287_v27 }
 0x44e   :  { %v935_v10 = vmul.f32 %v1660_v2, %v934_v30  ;;  %vm982_vm3 = vcmp.eq.f32.partialorder %v981_v37, 8.507059e+37  ;;  %v824_v30 = vmul.f32 0.5, %v2281_v60 }
 0x44f   :  { %v1553_v56 = vclamps-f32 %v906_v21, 1.0  ;;  %v1552_v29 = vclamps-f32 %v866_v46, 1.0 }
 0x450   :  { %v936_v11 = vadd.f32 %v1660_v2, %v935_v10  ;;  %v821_v10 = vmul.f32 0.5, %v2246_v62 }
 0x451   :  { %v1662_v19 = vpop.eup %1661  ;;  %v990_v31 = vadd.f32 1.0, %v1553_v56  ;;  %v989_v27 = vadd.f32 1.0, %v1552_v29 }
 0x452   :  { %v940_v58 = vsel %vm939_vm9, %v1660_v2, %v936_v11  ;;  %v973_v50 = vmul.f32 %v1662_v19, %v2332_v61  ;;  %vm978_vm15 = vweird.f32 %v1662_v19  ;;  %v1022_v11 = vpop.permute.xlu0 %1021 }
 0x453   :  { %v945_v13 = vsel %vm942_vm12, %v944_v17, %v940_v58  ;;  %vm979_vm2 = vmor %vm977_vm1, %vm978_vm15  ;;  %v994_v8 = vmul.f32 %v990_v31, %v822_v32  ;;  %v993_v44 = vmul.f32 %v989_v27, %v821_v10 }
 0x454   :  { %v974_v40 = vsub.f32 1.0, %v973_v50  ;;  %v946_v25 = vmul.f32 %v945_v13, %v921_v15 }
 0x455   :  { %v1002_v59 = vpack.c.bf16 %v994_v8, %v993_v44 }
 0x456   :  { %v975_v42 = vmul.f32 %v1662_v19, %v974_v40  ;;  %v1554_v2 = vclamps-f32 %v946_v25, 1.0 }
 0x458   :  { %v976_v34 = vadd.f32 %v1662_v19, %v975_v42  ;;  %v991_v38 = vadd.f32 1.0, %v1554_v2 }
 0x45a   :  { %v980_v48 = vsel %vm979_vm2, %v1662_v19, %v976_v34  ;;  %v995_v20 = vmul.f32 %v991_v38, %v823_v3  ;;  %v1017_v45 = vpop.permute.xlu0 %1016  ;;  %v1106_v38 = vpop.permute.xlu2 %1105 }
 0x45b   :  { %v985_v49 = vsel %vm982_vm3, %v984_v33, %v980_v48 }
 0x45c   :  { %v986_v52 = vmul.f32 %v985_v49, %v961_v47 }
 0x45e   :  { %v1555_v23 = vclamps-f32 %v986_v52, 1.0 }
 0x460   :  { %v992_v61 = vadd.f32 1.0, %v1555_v23 }
 0x462   :  { %v996_v7 = vmul.f32 %v992_v61, %v824_v30 }
 0x464   :  { %v1003_v12 = vpack.c.bf16 %v996_v7, %v995_v20 }
 0x466   :  { %1051 = vmatpush.bf16.msrb.mxu2 %v1003_v12 }
 0x46a   :  { %1052 = vmatpush.bf16.msrb.mxu2 %v1002_v59 }
 0x46d   :  { %1572 = vmatmul.msk.bf16.vlgmr.msrb.gmra.mxu2 %vm80_vm0, %v1626_v51 }
 0x47d   :  { %1573 = vmatmul.msk.bf16.gmra.mxu2 %vm80_vm0, %v1627_v14 }
 0x4f0   :  { %v1054_v60 = vpop.f32.mrf.mxu2 }
 0x4f1   :  { %v1055_v26 = vadd.f32 %v1054_v60, %v1012_v22 }
 0x4f3   :  { %v2401_v35 = vadd.f32 %v1055_v26, %v2234_v6  ;;  %v1091_v6 = vpop.permute.xlu0 %1090 }
 0x4f8   :  { %v1056_v62 = vpop.f32.mrf.mxu2 }
 0x4f9   :  { %v1057_v18 = vadd.f32 %v1056_v62, %v1017_v45 }
 0x4fb   :  { %v2396_v54 = vadd.f32 %v1057_v18, %v2229_v1  ;;  %v1101_v1 = vpop.permute.xlu1 %1100 }
 0x4fd   :  { %v1081_v9 = vpack.c.bf16 %v2396_v54, %v2401_v35 }
 0x500   :  { %v1059_v36 = vpop.f32.mrf.mxu2 }
 0x501   :  { %v1060_v5 = vadd.f32 %v1059_v36, %v1022_v11 }
 0x503   :  { %v2390_v58 = vadd.f32 %v1060_v5, %v2223_v63  ;;  %v1628_v63 = vld [vmem:[%s2565_s3 + $0x30] sm:$0xff]  ;;  %v1096_v40 = vpop.permute.xlu1 %1095 }
 0x508   :  { %v1061_v16 = vpop.f32.mrf.mxu2 }
 0x509   :  { %v1062_v19 = vadd.f32 %v1061_v16, %v1027_v55 }
 0x50b   :  { %v2393_v17 = vadd.f32 %v1062_v19, %v2226_v0  ;;  %v1629_v0 = vld [vmem:[%s2565_s3 + $0x38] sm:$0xff] }
 0x50d   :  { %v1082_v50 = vpack.c.bf16 %v2393_v17, %v2390_v58 }
 0x50f   :  { %1130 = vmatpush.bf16.msrb.mxu3 %v1082_v50 }
 0x513   :  { %1131 = vmatpush.bf16.msrb.mxu3 %v1081_v9 }
 0x516   :  { %1590 = vmatmul.msk.bf16.vlgmr.msrb.gmra.mxu3 %vm80_vm0, %v1628_v63 }
 0x526   :  { %1591 = vmatmul.msk.bf16.gmra.mxu3 %vm80_vm0, %v1629_v0 }
 0x599   :  { %v1133_v13 = vpop.f32.mrf.mxu3 }
 0x59a   :  { %v2413_v28 = vadd.f32 %v1133_v13, %v1091_v6 }
 0x59c   :  { %v2416_v57 = vmul.f32 0.70710677, %v2413_v28 }
 0x59e   :  { %v1151_v53 = vmul.f32 %v2416_v57, %v2416_v57 }
 0x5a0   :  { %v2420_v15 = vmin.f32 %v1151_v53, 16.0 }
 0x5a1   :  { %v1135_v41 = vpop.f32.mrf.mxu3 }
 0x5a2   :  { %v1164_v43 = vmul.f32 3.8918573e-05, %v2420_v15  ;;  %v2423_v39 = vadd.f32 %v1135_v41, %v1096_v40  ;;  %v1153_v31 = vmul.f32 2.1237322e-06, %v2420_v15 }
 0x5a4   :  { %v1165_v24 = vadd.f32 0.001143296, %v1164_v43  ;;  %v2426_v25 = vmul.f32 0.70710677, %v2423_v39  ;;  %v1154_v44 = vadd.f32 0.00028619796, %v1153_v31 }
 0x5a6   :  { %v1166_v42 = vmul.f32 %v1165_v24, %v2420_v15  ;;  %v1191_v37 = vmul.f32 %v2426_v25, %v2426_v25  ;;  %v1155_v45 = vmul.f32 %v1154_v44, %v2420_v15 }
 0x5a8   :  { %v1167_v4 = vadd.f32 0.014752088, %v1166_v42  ;;  %v2431_v34 = vmin.f32 %v1191_v37, 16.0  ;;  %v1156_v13 = vadd.f32 0.0036580483, %v1155_v45 }
 0x5a9   :  { %v1138_v21 = vpop.f32.mrf.mxu3 }
 0x5aa   :  { %v1168_v33 = vmul.f32 %v1167_v4, %v2420_v15  ;;  %v2434_v46 = vadd.f32 %v1138_v21, %v1101_v1  ;;  %v1204_v47 = vmul.f32 3.8918573e-05, %v2431_v34  ;;  %v1193_v20 = vmul.f32 2.1237322e-06, %v2431_v34 }
 0x5ab   :  { %v1157_v37 = vmul.f32 %v1156_v13, %v2420_v15 }
 0x5ac   :  { %v1169_v2 = vadd.f32 0.112945676, %v1168_v33  ;;  %v1205_v48 = vadd.f32 0.001143296, %v1204_v47  ;;  %v2438_v49 = vmul.f32 0.70710677, %v2434_v46 }
 0x5ad   :  { %v1194_v51 = vadd.f32 0.00028619796, %v1193_v20 }
 0x5ae   :  { %v1170_v52 = vmul.f32 %v1169_v2, %v2420_v15  ;;  %v1206_v56 = vmul.f32 %v1205_v48, %v2431_v34  ;;  %v1231_v23 = vmul.f32 %v2438_v49, %v2438_v49 }
 0x5af   :  { %v1195_v18 = vmul.f32 %v1194_v51, %v2431_v34 }
 0x5b0   :  { %v1207_v29 = vadd.f32 0.014752088, %v1206_v56  ;;  %v2444_v3 = vmin.f32 %v1231_v23, 16.0  ;;  %v1171_v32 = vadd.f32 0.4994258, %v1170_v52 }
 0x5b1   :  { %v1140_v30 = vpop.f32.mrf.mxu3  ;;  %v1196_v53 = vadd.f32 0.0036580483, %v1195_v18  ;;  %v1158_v23 = vadd.f32 0.05243302, %v1157_v37 }
 0x5b2   :  { %v2446_v61 = vadd.f32 %v1140_v30, %v1106_v38  ;;  %v1208_v7 = vmul.f32 %v1207_v29, %v2431_v34  ;;  %v1233_v27 = vmul.f32 2.1237322e-06, %v2444_v3  ;;  %v1244_v10 = vmul.f32 3.8918573e-05, %v2444_v3 }
 0x5b3   :  { %v1172_v59 = vmul.f32 %v1171_v32, %v2420_v15  ;;  %v1197_v4 = vmul.f32 %v1196_v53, %v2431_v34 }
 0x5b4   :  { %v2454_v12 = vmul.f32 0.70710677, %v2446_v61  ;;  %v1209_v8 = vadd.f32 0.112945676, %v1208_v7  ;;  %v1234_v60 = vadd.f32 0.00028619796, %v1233_v27 }
 0x5b5   :  { %v1245_v62 = vadd.f32 0.001143296, %v1244_v10  ;;  %v2464_v16 = vadd.f32 1.0, %v1172_v59  ;;  %v1198_v38 = vadd.f32 0.05243302, %v1197_v4 }
 0x5b6   :  { %v1210_v14 = vmul.f32 %v1209_v8, %v2431_v34  ;;  %v1271_v11 = vmul.f32 %v2454_v12, %v2454_v12  ;;  %v1235_v22 = vmul.f32 %v1234_v60, %v2444_v3  ;;  %v1159_v8 = vmul.f32 %v1158_v23, %v2420_v15 }
 0x5b7   :  { %v1246_v55 = vmul.f32 %v1245_v62, %v2444_v3  ;;  %1663 = vrcp.f32 %v2464_v16  ;;  %v1199_v44 = vmul.f32 %v1198_v38, %v2431_v34  ;;  %vm1179_vm4 = vweird.f32 %v2464_v16 }
 0x5b8   :  { %v1211_v36 = vadd.f32 0.4994258, %v1210_v14  ;;  %v2461_v5 = vmin.f32 %v1271_v11, 16.0  ;;  %v1236_v40 = vadd.f32 0.0036580483, %v1235_v22 }
 0x5b9   :  { %v1247_v26 = vadd.f32 0.014752088, %v1246_v55  ;;  %v1200_v55 = vadd.f32 0.18741608, %v1199_v44 }
 0x5ba   :  { %v1212_v19 = vmul.f32 %v1211_v36, %v2431_v34  ;;  %v1273_v50 = vmul.f32 2.1237322e-06, %v2461_v5  ;;  %v1284_v9 = vmul.f32 3.8918573e-05, %v2461_v5  ;;  %v1237_v33 = vmul.f32 %v1236_v40, %v2444_v3 }
 0x5bb   :  { %v1248_v0 = vmul.f32 %v1247_v26, %v2444_v3  ;;  %v1160_v36 = vadd.f32 0.18741608, %v1159_v8 }
 0x5bc   :  { %v2471_v63 = vadd.f32 1.0, %v1212_v19  ;;  %v1274_v1 = vadd.f32 0.00028619796, %v1273_v50  ;;  %v1285_v6 = vadd.f32 0.001143296, %v1284_v9 }
 0x5bd   :  { %v1249_v41 = vadd.f32 0.112945676, %v1248_v0  ;;  %v2483_v52 = vpop.eup %1663  ;;  %v1238_v31 = vadd.f32 0.05243302, %v1237_v33  ;;  %v1161_v0 = vmul.f32 %v1160_v36, %v2420_v15 }
 0x5be   :  { %1665 = vrcp.f32 %v2471_v63  ;;  %v1275_v43 = vmul.f32 %v1274_v1, %v2461_v5  ;;  %v1286_v24 = vmul.f32 %v1285_v6, %v2461_v5  ;;  %v1175_v32 = vmul.f32 %v2483_v52, %v2464_v16 }
 0x5bf   :  { %v1250_v42 = vmul.f32 %v1249_v41, %v2444_v3  ;;  %v1239_v59 = vmul.f32 %v1238_v31, %v2444_v3  ;;  %v1201_v1 = vmul.f32 %v1200_v55, %v2431_v34  ;;  %vm1180_vm5 = vweird.f32 %v2483_v52 }
 0x5c0   :  { %v1287_v21 = vadd.f32 0.014752088, %v1286_v24  ;;  %v1276_v2 = vadd.f32 0.0036580483, %v1275_v43  ;;  %v1176_v14 = vsub.f32 1.0, %v1175_v32  ;;  %vm2515_vm8 = vmor %vm1179_vm4, %vm1180_vm5  ;;  %vm1219_vm9 = vweird.f32 %v2471_v63 }
 0x5c1   :  { %v1251_v47 = vadd.f32 0.4994258, %v1250_v42  ;;  %v1240_v45 = vadd.f32 0.18741608, %v1239_v59  ;;  %v1183_v6 = vand.u32 2147483647, %v2464_v16 }
 0x5c2   :  { %v1288_v48 = vmul.f32 %v1287_v21, %v2461_v5  ;;  %v1277_v7 = vmul.f32 %v1276_v2, %v2461_v5  ;;  %v1177_v22 = vmul.f32 %v2483_v52, %v1176_v14  ;;  %v1202_v37 = vadd.f32 1.1283791, %v1201_v1  ;;  %v1630_v42 = vld [vmem:[%s2567_s5 + $0x30] sm:$0xff] }
 0x5c3   :  { %v1252_v29 = vmul.f32 %v1251_v47, %v2444_v3  ;;  %v1241_v13 = vmul.f32 %v1240_v45, %v2444_v3  ;;  %v1185_v3 = vand.u32 2147483648, %v2464_v16  ;;  %v1225_v4 = vand.u32 2147483648, %v2471_v63 }
 0x5c4   :  { %v2485_v56 = vpop.eup %1665  ;;  %v1289_v30 = vadd.f32 0.112945676, %v1288_v48  ;;  %v1278_v60 = vadd.f32 0.05243302, %v1277_v7  ;;  %v1178_v40 = vadd.f32 %v2483_v52, %v1177_v22  ;;  %v1223_v33 = vand.u32 2147483647, %v2471_v63 }
 0x5c5   :  { %v1253_v20 = vadd.f32 1.0, %v1252_v29  ;;  %v1215_v10 = vmul.f32 %v2485_v56, %v2471_v63  ;;  %vm1220_vm6 = vweird.f32 %v2485_v56  ;;  %v1242_v47 = vadd.f32 1.1283791, %v1241_v13 }
 0x5c6   :  { %v1290_v27 = vmul.f32 %v1289_v30, %v2461_v5  ;;  %v1279_v26 = vmul.f32 %v1278_v60, %v2461_v5  ;;  %vm2522_vm10 = vmor %vm1219_vm9, %vm1220_vm6  ;;  %v1162_v23 = vadd.f32 1.1283791, %v1161_v0  ;;  %v1182_v16 = vsel %vm2515_vm8, %v2483_v52, %v1178_v40 }
 0x5c7   :  { %1667 = vrcp.f32 %v1253_v20  ;;  %v1216_v62 = vsub.f32 1.0, %v1215_v10  ;;  %v1265_v41 = vand.u32 2147483648, %v1253_v20  ;;  %v1263_v34 = vand.u32 2147483647, %v1253_v20 }
 0x5c8   :  { %v1291_v51 = vadd.f32 0.4994258, %v1290_v27  ;;  %v1280_v43 = vadd.f32 0.18741608, %v1279_v26  ;;  %vm1259_vm11 = vweird.f32 %v1253_v20  ;;  %vm1184_vm14 = vcmp.eq.f32.partialorder %v1183_v6, 8.507059e+37 }
 0x5c9   :  { %v1217_v50 = vmul.f32 %v2485_v56, %v1216_v62  ;;  %v1266_v38 = vor.u32 1.1754944e-38, %v1265_v41  ;;  %vm1264_vm13 = vcmp.eq.f32.partialorder %v1263_v34, 8.507059e+37  ;;  %v1186_v32 = vor.u32 1.1754944e-38, %v1185_v3 }
 0x5ca   :  { %v1292_v11 = vmul.f32 %v1291_v51, %v2461_v5  ;;  %v1281_v29 = vmul.f32 %v1280_v43, %v2461_v5  ;;  %v1203_v27 = vmul.f32 %v1202_v37, %v2426_v25  ;;  %vm1224_vm15 = vcmp.eq.f32.partialorder %v1223_v33, 8.507059e+37  ;;  %v1344_v37 = vpop.permute.xlu1 %1343 }
 0x5cb   :  { %v1218_v15 = vadd.f32 %v2485_v56, %v1217_v50  ;;  %v1243_v52 = vmul.f32 %v1242_v47, %v2438_v49  ;;  %v1187_v8 = vsel %vm1184_vm14, %v1186_v32, %v1182_v16  ;;  %v1163_v60 = vmul.f32 %v1162_v23, %v2416_v57 }
 0x5cc   :  { %v2498_v18 = vadd.f32 1.0, %v1292_v11  ;;  %v1282_v44 = vadd.f32 1.1283791, %v1281_v29  ;;  %v1145_v57 = vmul.f32 0.5, %v2434_v46  ;;  %v1146_v6 = vmul.f32 0.5, %v2446_v61  ;;  %v1339_v61 = vpop.permute.xlu0 %1338 }
 0x5cd   :  { %v1668_v19 = vpop.eup %1667  ;;  %v1222_v30 = vsel %vm2522_vm10, %v2485_v56, %v1218_v15  ;;  %v1188_v25 = vmul.f32 %v1187_v8, %v1163_v60 }
 0x5ce   :  { %v1255_v9 = vmul.f32 %v1668_v19, %v1253_v20  ;;  %1669 = vrcp.f32 %v2498_v18  ;;  %vm1260_vm7 = vweird.f32 %v1668_v19  ;;  %v1226_v20 = vor.u32 1.1754944e-38, %v1225_v4 }
 0x5cf   :  { %vm1261_vm12 = vmor %vm1259_vm11, %vm1260_vm7  ;;  %v1305_v59 = vand.u32 2147483648, %v2498_v18  ;;  %v1303_v14 = vand.u32 2147483647, %v2498_v18  ;;  %vm1299_vm2 = vweird.f32 %v2498_v18  ;;  %v1283_v55 = vmul.f32 %v1282_v44, %v2454_v12 }
 0x5d0   :  { %v1256_v53 = vsub.f32 1.0, %v1255_v9  ;;  %v1227_v5 = vsel %vm1224_vm15, %v1226_v20, %v1222_v30  ;;  %v1592_v50 = vclamps-f32 %v1188_v25, 1.0  ;;  %v1143_v12 = vmul.f32 0.5, %v2413_v28  ;;  %v1334_v28 = vpop.permute.xlu2 %1333 }
 0x5d1   :  { %v1228_v62 = vmul.f32 %v1227_v5, %v1203_v27  ;;  %v1306_v49 = vor.u32 1.1754944e-38, %v1305_v59  ;;  %vm1304_vm4 = vcmp.eq.f32.partialorder %v1303_v14, 8.507059e+37 }
 0x5d2   :  { %v1257_v24 = vmul.f32 %v1668_v19, %v1256_v53  ;;  %v1311_v13 = vadd.f32 1.0, %v1592_v50  ;;  %v1144_v53 = vmul.f32 0.5, %v2423_v39  ;;  %v1631_v39 = vld [vmem:[%s2567_s5 + $0x38] sm:$0xff]  ;;  %v1410_v29 = vpop.permute.xlu1 %1409  ;;  %s1698_s5 = smov [#allocation4]  }
 0x5d3   :  { %v1593_v22 = vclamps-f32 %v1228_v62, 1.0  ;;  %s1449_s28 = sshll.u32 %s1698_s5, 4  ;;  %s1450_s28 = int_to_ptr.vmem [resolvable:$true] %s1449_s28 }
 0x5d4   :  { %v1258_v2 = vadd.f32 %v1668_v19, %v1257_v24  ;;  %v1670_v48 = vpop.eup %1669  ;;  %v1315_v24 = vmul.f32 %v1311_v13, %v1143_v12 }
 0x5d5   :  { %v1295_v63 = vmul.f32 %v1670_v48, %v2498_v18  ;;  %vm1300_vm1 = vweird.f32 %v1670_v48  ;;  %v1312_v1 = vadd.f32 1.0, %v1593_v22 }
 0x5d6   :  { %v1262_v31 = vsel %vm1261_vm12, %v1668_v19, %v1258_v2  ;;  %vm1301_vm3 = vmor %vm1299_vm2, %vm1300_vm1 }
 0x5d7   :  { %v1267_v7 = vsel %vm1264_vm13, %v1266_v38, %v1262_v31  ;;  %v1296_v10 = vsub.f32 1.0, %v1295_v63  ;;  %v1316_v43 = vmul.f32 %v1312_v1, %v1144_v53 }
 0x5d8   :  { %v1268_v56 = vmul.f32 %v1267_v7, %v1243_v52  ;;  %v1349_v4 = vpop.permute.xlu2 %1348 }
 0x5d9   :  { %v1297_v51 = vmul.f32 %v1670_v48, %v1296_v10  ;;  %v1324_v34 = vpack.c.bf16 %v1316_v43, %v1315_v24 }
 0x5da   :  { %v1594_v36 = vclamps-f32 %v1268_v56, 1.0 }
 0x5db   :  { %v1298_v11 = vadd.f32 %v1670_v48, %v1297_v51  ;;  %v1439_v51 = vpop.permute.xlu1 %1438 }
 0x5dc   :  { %v1313_v9 = vadd.f32 1.0, %v1594_v36  ;;  %v1441_v14 = vperm.slane %v1439_v51, 0 }
 0x5dd   :  { %v1302_v45 = vsel %vm1301_vm3, %v1670_v48, %v1298_v11  ;;  %v1405_v48 = vpop.permute.xlu0 %1404 }
 0x5de   :  { %v1307_v19 = vsel %vm1304_vm4, %v1306_v49, %v1302_v45  ;;  %v1317_v40 = vmul.f32 %v1313_v9, %v1145_v57 }
 0x5df   :  { %v1308_v26 = vmul.f32 %v1307_v19, %v1283_v55 }
 0x5e0   :  { %v1415_v31 = vpop.permute.xlu2 %1414 }
 0x5e1   :  { %v1595_v0 = vclamps-f32 %v1308_v26, 1.0 }
 0x5e3   :  { %v1314_v18 = vadd.f32 1.0, %v1595_v0 }
 0x5e5   :  { %v1318_v41 = vmul.f32 %v1314_v18, %v1146_v6  ;;  %v1420_v10 = vpop.permute.xlu0 %1419 }
 0x5e7   :  { %v1325_v15 = vpack.c.bf16 %v1318_v41, %v1317_v40 }
 0x5e9   :  { %1373 = vmatpush.bf16.msra.mxu0 %v1325_v15 }
 0x5ed   :  { %1374 = vmatpush.bf16.msra.mxu0 %v1324_v34 }
 0x5f0   :  { %1612 = vmatmul.msk.bf16.vlgmr.msra.gmra.mxu0 %vm80_vm0, %v1630_v42 }
 0x600   :  { %1613 = vmatmul.msk.bf16.gmra.mxu0 %vm80_vm0, %v1631_v39 }
 0x66d   :  { %v1376_v46 = vpop.f32.mrf.mxu0 }
 0x66e   :  { %v1377_v47 = vadd.f32 %v1376_v46, %v1334_v28 }
 0x670   :  { %v1386_v16 = vadd.f32 %v1377_v47, %v2401_v35 }
 0x672   :  { %v1422_v32 = vmul.f32 %v1405_v48, %v1386_v16 }
 0x675   :  { %v1378_v3 = vpop.f32.mrf.mxu0 }
 0x676   :  { %v1379_v21 = vadd.f32 %v1378_v3, %v1339_v61 }
 0x678   :  { %v1387_v23 = vadd.f32 %v1379_v21, %v2396_v54 }
 0x67a   :  { %v1423_v30 = vmul.f32 %v1410_v29, %v1387_v23 }
 0x67c   :  { %v1426_v27 = vadd.f32 %v1423_v30, %v1422_v32 }
 0x67d   :  { %v1381_v33 = vpop.f32.mrf.mxu0 }
 0x67e   :  { %v1382_v2 = vadd.f32 %v1381_v33, %v1344_v37 }
 0x680   :  { %v1388_v38 = vadd.f32 %v1382_v2, %v2390_v58 }
 0x682   :  { %v1424_v20 = vmul.f32 %v1415_v31, %v1388_v38 }
 0x684   :  { %v1427_v8 = vadd.f32 %v1426_v27, %v1424_v20 }
 0x685   :  { %v1383_v63 = vpop.f32.mrf.mxu0 }
 0x686   :  { %v1384_v7 = vadd.f32 %v1383_v63, %v1349_v4 }
 0x688   :  { %v1389_v52 = vadd.f32 %v1384_v7, %v2393_v17 }
 0x68a   :  { %v1425_v5 = vmul.f32 %v1420_v10, %v1389_v52 }
 0x68c   :  { %v1428_v44 = vadd.f32 %v1427_v8, %v1425_v5 }
 0x68e   :  { %v1429_v59 = vrot.slane %v1428_v44, 4 }
 0x690   :  { %v1430_v54 = vadd.f32 %v1429_v59, %v1428_v44 }
 0x692   :  { %v1431_v56 = vrot.slane %v1430_v54, 2 }
 0x694   :  { %v1432_v35 = vadd.f32 %v1431_v56, %v1430_v54 }
 0x696   :  { %v1433_v58 = vrot.slane %v1432_v35, 1 }
 0x698   :  { %v1434_v60 = vadd.f32 %v1433_v58, %v1432_v35 }
 0x69a   :  { %v1442_v62 = vadd.f32 %v1441_v14, %v1434_v60 }
 0x69c   :  { %1443 = vst [vmem:[#allocation4] sm:$0x1] %v1442_v62 }
 0x69d   :  { %1454 = dma.vmem_to_hbm [thread:$0]  %s1450_s28, 16, %s1452_s29, [#allocation5]  }
 0x69e   :  { %1695 = dma.done.wait [#allocation5], 16  }
 0x69f   :  { %1696 = vsyncadd [#allocation5], 4294967280 }
 0x6a0   :  { %1459 = vsyncpa [#allocation5], 1 }

</bundles_post_ra>
